<compile_context>
chip_gen: v6e
topology: v6e:2x2x1
jax: 0.10.0
libtpu: 0.0.40
codegen_flags: <defaults>
</compile_context>

<pallas_src>
import functools

import jax
import jax.numpy as jnp
from jax.experimental import pallas as pl
from jax.experimental.pallas import tpu as pltpu

NEG_SLOPE = 0.2  # LeakyReLU negative_slope used everywhere in the module


# ----------------------------------------------------------------------------
# Pallas kernels
# ----------------------------------------------------------------------------
def _gemm_bias_act_kernel(x_ref, w_ref, b_ref, o_ref, *, act):
    """Single-K-tile GEMM with fused bias + activation ("none" | "leaky")."""
    y = jnp.dot(x_ref[...], w_ref[...], preferred_element_type=jnp.float32)
    y = y + b_ref[...]                     # bias broadcast over rows
    if act == "leaky":
        y = jnp.where(y > 0, y, NEG_SLOPE * y)
    o_ref[...] = y.astype(o_ref.dtype)


def _fc_sigmoid_kernel(x_ref, w_ref, b_ref, o_ref):
    """Linear(K -> 1) + sigmoid as a lane reduction (N=1, so skip the MXU)."""
    y = jnp.sum(x_ref[...] * w_ref[...], axis=-1, keepdims=True) + b_ref[...]
    o_ref[...] = jax.nn.sigmoid(y)


# ----------------------------------------------------------------------------
# Helpers
# ----------------------------------------------------------------------------
def _round_up(x, m):
    return (x + m - 1) // m * m


def _choose_tm(m):
    """Pick an M tile: one block for small M, 256-row blocks otherwise."""
    m8 = _round_up(m, 8)
    if m8 <= 256:
        return m8, m8
    return 256, _round_up(m, 256)


def _choose_tn(n_pad):
    for tn in (512, 256, 128):
        if n_pad % tn == 0:
            return tn
    return n_pad


# ----------------------------------------------------------------------------
# Pallas wrappers
# ----------------------------------------------------------------------------
def matmul_bias_act(x, w_pad, b_pad, out_n, act="none"):
    """x: (M, K) unpadded; w_pad: (Kp, Np), b_pad: (1, Np) pre-padded at init.

    Returns act(x @ w + b)[:, :out_n] computed with a single full-K Pallas
    GEMM per (i, j) tile (no k grid axis, no accumulator scratch).
    """
    M, K = x.shape
    Kp, Np = w_pad.shape
    tm, Mp = _choose_tm(M)
    tn = _choose_tn(Np)

    xp = x.astype(jnp.float32)
    if (Mp, Kp) != (M, K):
        xp = jnp.zeros((Mp, Kp), jnp.float32).at[:M, :K].set(xp)

    out = pl.pallas_call(
        functools.partial(_gemm_bias_act_kernel, act=act),
        out_shape=jax.ShapeDtypeStruct((Mp, Np), jnp.float32),
        grid_spec=pltpu.PrefetchScalarGridSpec(
            num_scalar_prefetch=0,
            grid=(Mp // tm, Np // tn),
            in_specs=[
                pl.BlockSpec((tm, Kp), lambda i, j: (i, 0)),
                pl.BlockSpec((Kp, tn), lambda i, j: (0, j)),
                pl.BlockSpec((1, tn), lambda i, j: (0, j)),
            ],
            out_specs=pl.BlockSpec((tm, tn), lambda i, j: (i, j)),
        ),
        compiler_params=pltpu.CompilerParams(
            dimension_semantics=("parallel", "parallel")),
    )(xp, w_pad, b_pad)
    return out[:M, :out_n]


def fc_sigmoid(x, w_row, b):
    """x: (B, K); w_row: (1, Kp) pre-padded; b: (1, 1) -> sigmoid(x @ w.T + b)."""
    B, K = x.shape
    Kp = w_row.shape[1]
    Bp = _round_up(B, 8)
    xp = jnp.zeros((Bp, Kp), jnp.float32).at[:B, :K].set(x.astype(jnp.float32))
    out = pl.pallas_call(
        _fc_sigmoid_kernel,
        out_shape=jax.ShapeDtypeStruct((Bp, 1), jnp.float32),
    )(xp, w_row, b)
    return out[:B]


# ----------------------------------------------------------------------------
# JAX glue: im2col + conv
# ----------------------------------------------------------------------------
def _im2col(x, kh, kw, stride, padding):
    """x: (B, C, H, W) -> (B*OH*OW, C*kh*kw), patch features ordered (C, kh, kw)."""
    B, C, H, W = x.shape
    if padding:
        x = jnp.pad(x, ((0, 0), (0, 0), (padding, padding), (padding, padding)))
    Hp, Wp = H + 2 * padding, W + 2 * padding
    OH = (Hp - kh) // stride + 1
    OW = (Wp - kw) // stride + 1
    cols = []
    for i in range(kh):
        for j in range(kw):
            cols.append(x[:, :, i:i + stride * OH:stride, j:j + stride * OW:stride])
    p = jnp.stack(cols, axis=2)                       # (B, C, kh*kw, OH, OW)
    p = p.transpose(0, 3, 4, 1, 2).reshape(B * OH * OW, C * kh * kw)
    return p, OH, OW
    # TODO(synk): patch extraction is still materialized in HBM; for this
    # model the patch tensors are < 200 KB so fusing im2col into the kernel
    # is not worth the complexity.


def conv2d(x, w_pad, b_pad, cout, kh, kw, stride, padding, act):
    """x: (B, Cin, H, W) -> (B, cout, OH, OW). Weights pre-packed to GEMM form."""
    B = x.shape[0]
    patches, OH, OW = _im2col(x, kh, kw, stride, padding)
    y = matmul_bias_act(patches, w_pad, b_pad, out_n=cout, act=act)
    return y.reshape(B, OH, OW, cout).transpose(0, 3, 1, 2)


# ----------------------------------------------------------------------------
# Parameters (deterministic synthetic init, shapes from the nn.Module __init__)
# ----------------------------------------------------------------------------
def _prep_conv(w, b):
    """(Cout, Cin, kh, kw) weight -> zero-padded (Kp, Np) GEMM matrix + (1, Np) bias."""
    cout, cin, kh, kw = w.shape
    k = cin * kh * kw
    kp, np_ = _round_up(k, 128), _round_up(cout, 128)
    wmat = w.reshape(cout, k).T.astype(jnp.float32)          # (K, Cout)
    w_pad = jnp.zeros((kp, np_), jnp.float32).at[:k, :cout].set(wmat)
    b_pad = jnp.zeros((1, np_), jnp.float32).at[0, :cout].set(b.astype(jnp.float32))
    return w_pad, b_pad


def init_params(key, n_nodes=28):
    def conv_out(n):
        return (n - 3) // 2 + 1

    fc_len = conv_out(conv_out(conv_out(n_nodes)))            # == init_run()
    fc_in = 64 * fc_len ** 2
    ks = jax.random.split(key, 8)
    s = 0.05
    raw = {
        "conv1_w": jax.random.normal(ks[0], (64, 1, 3, 3), jnp.float32) * s,
        "conv1_b": jax.random.normal(ks[1], (64,), jnp.float32) * s,
        "conv2_w": jax.random.normal(ks[2], (64, 64, 3, 3), jnp.float32) * s,
        "conv2_b": jax.random.normal(ks[3], (64,), jnp.float32) * s,
        "conv3_w": jax.random.normal(ks[4], (64, 64, 3, 3), jnp.float32) * s,
        "conv3_b": jax.random.normal(ks[5], (64,), jnp.float32) * s,
        "fc_w": jax.random.normal(ks[6], (1, fc_in), jnp.float32) * s,  # (out, in)
        "fc_b": jax.random.normal(ks[7], (1,), jnp.float32) * s,
    }
    # Pack weights into GEMM-ready, tile-aligned form ONCE (never per forward).
    c1w, c1b = _prep_conv(raw["conv1_w"], raw["conv1_b"])
    c2w, c2b = _prep_conv(raw["conv2_w"], raw["conv2_b"])
    c3w, c3b = _prep_conv(raw["conv3_w"], raw["conv3_b"])
    kp_fc = _round_up(fc_in, 128)
    fc_w = jnp.zeros((1, kp_fc), jnp.float32).at[0, :fc_in].set(
        raw["fc_w"][0].astype(jnp.float32))
    fc_b = raw["fc_b"].reshape(1, 1).astype(jnp.float32)
    return {
        "conv1_w": c1w, "conv1_b": c1b,
        "conv2_w": c2w, "conv2_b": c2b,
        "conv3_w": c3w, "conv3_b": c3b,
        "fc_w": fc_w, "fc_b": fc_b,
    }


# ----------------------------------------------------------------------------
# Forward pass (inference: dropout = identity, no Gaussian noise)
# ----------------------------------------------------------------------------
def discriminator_forward(params, graph):
    """graph: (B, 1, n_nodes, n_nodes) -> (B, 1) sigmoid scores."""
    B = graph.shape[0]
    x = conv2d(graph, params["conv1_w"], params["conv1_b"],
               cout=64, kh=3, kw=3, stride=2, padding=0, act="leaky")
    # TODO(synk): training-mode Gaussian noise + Dropout2d (p=0.4) not
    # reproduced; inference mode treats both as identity.
    x = conv2d(x, params["conv2_w"], params["conv2_b"],
               cout=64, kh=3, kw=3, stride=2, padding=0, act="leaky")
    x = conv2d(x, params["conv3_w"], params["conv3_b"],
               cout=64, kh=3, kw=3, stride=2, padding=0, act="leaky")
    x = x.reshape(B, -1)                  # Flatten in (C, H, W) order, like torch
    return fc_sigmoid(x, params["fc_w"], params["fc_b"])


# ----------------------------------------------------------------------------
# Demo
# ----------------------------------------------------------------------------
if __name__ == "__main__":
    n_nodes = 28
    B = 2
    key = jax.random.PRNGKey(0)
    kp, kg = jax.random.split(key)

    params = init_params(kp, n_nodes)
    # binary adjacency-like input graph
    graph = (jax.random.uniform(kg, (B, 1, n_nodes, n_nodes)) > 0.5).astype(jnp.float32)

    fwd = jax.jit(discriminator_forward)
    out = fwd(params, graph)
    jax.block_until_ready(out)

    assert out.shape == (B, 1)
    assert out.dtype == jnp.float32
    # sigmoid outputs must lie in [0, 1]
    assert bool(jnp.all((out >= 0.0) & (out <= 1.0)))
    print("KERNEL_OK")
</pallas_src>

<mosaic_0001>
module attributes {stable_mosaic.version = 11 : i64} {
  func.func @_gemm_bias_act_kernel(%arg0: i32, %arg1: i32, %arg2: memref<256x128xf32, #tpu.memory_space<vmem>>, %arg3: memref<128x128xf32, #tpu.memory_space<vmem>>, %arg4: memref<1x128xf32, #tpu.memory_space<vmem>>, %arg5: memref<256x128xf32, #tpu.memory_space<vmem>>) attributes {dimension_semantics = [#tpu.dimension_semantics<parallel>, #tpu.dimension_semantics<parallel>], iteration_bounds = array<i64: 2, 1>, scalar_prefetch = 0 : i64, scratch_operands = 0 : i64, tpu.core_type = #tpu.core_type<tc>, window_params = [{transform_indices = @transform_0, window_bounds = array<i64: 256, 128>}, {transform_indices = @transform_1, window_bounds = array<i64: 128, 128>}, {transform_indices = @transform_2, window_bounds = array<i64: 1, 128>}, {transform_indices = @transform_3, window_bounds = array<i64: 256, 128>}]} {
    %c0 = arith.constant 0 : index
    %c0_0 = arith.constant 0 : index
    %0 = vector.load %arg2[%c0, %c0_0] : memref<256x128xf32, #tpu.memory_space<vmem>>, vector<256x128xf32>
    %c0_1 = arith.constant 0 : index
    %c0_2 = arith.constant 0 : index
    %1 = vector.load %arg3[%c0_1, %c0_2] : memref<128x128xf32, #tpu.memory_space<vmem>>, vector<128x128xf32>
    %cst = arith.constant dense<0.000000e+00> : vector<256x128xf32>
    %2 = tpu.matmul %0, %1, %cst {dimension_numbers = #tpu.dot_dimension_numbers<[1], [0], [0], [1], [0, 0, 1, 1], [], []>} : vector<256x128xf32>, vector<128x128xf32>, vector<256x128xf32> -> vector<256x128xf32>
    %c0_3 = arith.constant 0 : index
    %c0_4 = arith.constant 0 : index
    %3 = vector.load %arg4[%c0_3, %c0_4] : memref<1x128xf32, #tpu.memory_space<vmem>>, vector<1x128xf32>
    %4 = vector.broadcast %3 : vector<1x128xf32> to vector<256x128xf32>
    %5 = arith.addf %2, %4 : vector<256x128xf32>
    %cst_5 = arith.constant 0.000000e+00 : f32
    %6 = vector.broadcast %cst_5 : f32 to vector<256x128xf32>
    %7 = arith.cmpf ogt, %5, %6 : vector<256x128xf32>
    %cst_6 = arith.constant 2.000000e-01 : f32
    %8 = vector.broadcast %cst_6 : f32 to vector<256x128xf32>
    %9 = arith.mulf %8, %5 : vector<256x128xf32>
    %10 = arith.select %7, %5, %9 : vector<256x128xi1>, vector<256x128xf32>
    %c0_7 = arith.constant 0 : index
    %c0_8 = arith.constant 0 : index
    %11 = vector.load %arg5[%c0_7, %c0_8] : memref<256x128xf32, #tpu.memory_space<vmem>>, vector<256x128xf32>
    tpu.vector_store %arg5[%c0_7, %c0_8], %10 {strides = array<i32>} : memref<256x128xf32, #tpu.memory_space<vmem>>, vector<256x128xf32>,
    return
  }
  func.func @transform_0(%arg0: i32, %arg1: i32) -> (i32, i32) {
    %c0_i32 = arith.constant 0 : i32
    %c0_i32_0 = arith.constant 0 : i32
    return %arg0, %c0_i32 : i32, i32
  }
  func.func @transform_1(%arg0: i32, %arg1: i32) -> (i32, i32) {
    %c0_i32 = arith.constant 0 : i32
    %c0_i32_0 = arith.constant 0 : i32
    return %c0_i32, %arg1 : i32, i32
  }
  func.func @transform_2(%arg0: i32, %arg1: i32) -> (i32, i32) {
    %c0_i32 = arith.constant 0 : i32
    %c0_i32_0 = arith.constant 0 : i32
    return %c0_i32, %arg1 : i32, i32
  }
  func.func @transform_3(%arg0: i32, %arg1: i32) -> (i32, i32) {
    %c0_i32 = arith.constant 0 : i32
    return %arg0, %arg1 : i32, i32
  }
}

module attributes {stable_mosaic.version = 11 : i64} {
  func.func @_gemm_bias_act_kernel(%arg0: i32, %arg1: i32, %arg2: memref<72x640xf32, #tpu.memory_space<vmem>>, %arg3: memref<640x128xf32, #tpu.memory_space<vmem>>, %arg4: memref<1x128xf32, #tpu.memory_space<vmem>>, %arg5: memref<72x128xf32, #tpu.memory_space<vmem>>) attributes {dimension_semantics = [#tpu.dimension_semantics<parallel>, #tpu.dimension_semantics<parallel>], iteration_bounds = array<i64: 1, 1>, scalar_prefetch = 0 : i64, scratch_operands = 0 : i64, tpu.core_type = #tpu.core_type<tc>, window_params = [{transform_indices = @transform_0, window_bounds = array<i64: 72, 640>}, {transform_indices = @transform_1, window_bounds = array<i64: 640, 128>}, {transform_indices = @transform_2, window_bounds = array<i64: 1, 128>}, {transform_indices = @transform_3, window_bounds = array<i64: 72, 128>}]} {
    %c0 = arith.constant 0 : index
    %c0_0 = arith.constant 0 : index
    %0 = vector.load %arg2[%c0, %c0_0] : memref<72x640xf32, #tpu.memory_space<vmem>>, vector<72x640xf32>
    %c0_1 = arith.constant 0 : index
    %c0_2 = arith.constant 0 : index
    %1 = vector.load %arg3[%c0_1, %c0_2] : memref<640x128xf32, #tpu.memory_space<vmem>>, vector<640x128xf32>
    %cst = arith.constant dense<0.000000e+00> : vector<72x128xf32>
    %2 = tpu.matmul %0, %1, %cst {dimension_numbers = #tpu.dot_dimension_numbers<[1], [0], [0], [1], [0, 0, 1, 1], [], []>} : vector<72x640xf32>, vector<640x128xf32>, vector<72x128xf32> -> vector<72x128xf32>
    %c0_3 = arith.constant 0 : index
    %c0_4 = arith.constant 0 : index
    %3 = vector.load %arg4[%c0_3, %c0_4] : memref<1x128xf32, #tpu.memory_space<vmem>>, vector<1x128xf32>
    %4 = vector.broadcast %3 : vector<1x128xf32> to vector<72x128xf32>
    %5 = arith.addf %2, %4 : vector<72x128xf32>
    %cst_5 = arith.constant 0.000000e+00 : f32
    %6 = vector.broadcast %cst_5 : f32 to vector<72x128xf32>
    %7 = arith.cmpf ogt, %5, %6 : vector<72x128xf32>
    %cst_6 = arith.constant 2.000000e-01 : f32
    %8 = vector.broadcast %cst_6 : f32 to vector<72x128xf32>
    %9 = arith.mulf %8, %5 : vector<72x128xf32>
    %10 = arith.select %7, %5, %9 : vector<72x128xi1>, vector<72x128xf32>
    %c0_7 = arith.constant 0 : index
    %c0_8 = arith.constant 0 : index
    %11 = vector.load %arg5[%c0_7, %c0_8] : memref<72x128xf32, #tpu.memory_space<vmem>>, vector<72x128xf32>
    tpu.vector_store %arg5[%c0_7, %c0_8], %10 {strides = array<i32>} : memref<72x128xf32, #tpu.memory_space<vmem>>, vector<72x128xf32>,
    return
  }
  func.func @transform_0(%arg0: i32, %arg1: i32) -> (i32, i32) {
    %c0_i32 = arith.constant 0 : i32
    %c0_i32_0 = arith.constant 0 : i32
    return %arg0, %c0_i32 : i32, i32
  }
  func.func @transform_1(%arg0: i32, %arg1: i32) -> (i32, i32) {
    %c0_i32 = arith.constant 0 : i32
    %c0_i32_0 = arith.constant 0 : i32
    return %c0_i32, %arg1 : i32, i32
  }
  func.func @transform_2(%arg0: i32, %arg1: i32) -> (i32, i32) {
    %c0_i32 = arith.constant 0 : i32
    %c0_i32_0 = arith.constant 0 : i32
    return %c0_i32, %arg1 : i32, i32
  }
  func.func @transform_3(%arg0: i32, %arg1: i32) -> (i32, i32) {
    %c0_i32 = arith.constant 0 : i32
    return %arg0, %arg1 : i32, i32
  }
}

module attributes {stable_mosaic.version = 11 : i64} {
  func.func @_gemm_bias_act_kernel(%arg0: i32, %arg1: i32, %arg2: memref<8x640xf32, #tpu.memory_space<vmem>>, %arg3: memref<640x128xf32, #tpu.memory_space<vmem>>, %arg4: memref<1x128xf32, #tpu.memory_space<vmem>>, %arg5: memref<8x128xf32, #tpu.memory_space<vmem>>) attributes {dimension_semantics = [#tpu.dimension_semantics<parallel>, #tpu.dimension_semantics<parallel>], iteration_bounds = array<i64: 1, 1>, scalar_prefetch = 0 : i64, scratch_operands = 0 : i64, tpu.core_type = #tpu.core_type<tc>, window_params = [{transform_indices = @transform_0, window_bounds = array<i64: 8, 640>}, {transform_indices = @transform_1, window_bounds = array<i64: 640, 128>}, {transform_indices = @transform_2, window_bounds = array<i64: 1, 128>}, {transform_indices = @transform_3, window_bounds = array<i64: 8, 128>}]} {
    %c0 = arith.constant 0 : index
    %c0_0 = arith.constant 0 : index
    %0 = vector.load %arg2[%c0, %c0_0] : memref<8x640xf32, #tpu.memory_space<vmem>>, vector<8x640xf32>
    %c0_1 = arith.constant 0 : index
    %c0_2 = arith.constant 0 : index
    %1 = vector.load %arg3[%c0_1, %c0_2] : memref<640x128xf32, #tpu.memory_space<vmem>>, vector<640x128xf32>
    %cst = arith.constant dense<0.000000e+00> : vector<8x128xf32>
    %2 = tpu.matmul %0, %1, %cst {dimension_numbers = #tpu.dot_dimension_numbers<[1], [0], [0], [1], [0, 0, 1, 1], [], []>} : vector<8x640xf32>, vector<640x128xf32>, vector<8x128xf32> -> vector<8x128xf32>
    %c0_3 = arith.constant 0 : index
    %c0_4 = arith.constant 0 : index
    %3 = vector.load %arg4[%c0_3, %c0_4] : memref<1x128xf32, #tpu.memory_space<vmem>>, vector<1x128xf32>
    %4 = vector.broadcast %3 : vector<1x128xf32> to vector<8x128xf32>
    %5 = arith.addf %2, %4 : vector<8x128xf32>
    %cst_5 = arith.constant 0.000000e+00 : f32
    %6 = vector.broadcast %cst_5 : f32 to vector<8x128xf32>
    %7 = arith.cmpf ogt, %5, %6 : vector<8x128xf32>
    %cst_6 = arith.constant 2.000000e-01 : f32
    %8 = vector.broadcast %cst_6 : f32 to vector<8x128xf32>
    %9 = arith.mulf %8, %5 : vector<8x128xf32>
    %10 = arith.select %7, %5, %9 : vector<8x128xi1>, vector<8x128xf32>
    %c0_7 = arith.constant 0 : index
    %c0_8 = arith.constant 0 : index
    %11 = vector.load %arg5[%c0_7, %c0_8] : memref<8x128xf32, #tpu.memory_space<vmem>>, vector<8x128xf32>
    tpu.vector_store %arg5[%c0_7, %c0_8], %10 {strides = array<i32>} : memref<8x128xf32, #tpu.memory_space<vmem>>, vector<8x128xf32>,
    return
  }
  func.func @transform_0(%arg0: i32, %arg1: i32) -> (i32, i32) {
    %c0_i32 = arith.constant 0 : i32
    %c0_i32_0 = arith.constant 0 : i32
    return %arg0, %c0_i32 : i32, i32
  }
  func.func @transform_1(%arg0: i32, %arg1: i32) -> (i32, i32) {
    %c0_i32 = arith.constant 0 : i32
    %c0_i32_0 = arith.constant 0 : i32
    return %c0_i32, %arg1 : i32, i32
  }
  func.func @transform_2(%arg0: i32, %arg1: i32) -> (i32, i32) {
    %c0_i32 = arith.constant 0 : i32
    %c0_i32_0 = arith.constant 0 : i32
    return %c0_i32, %arg1 : i32, i32
  }
  func.func @transform_3(%arg0: i32, %arg1: i32) -> (i32, i32) {
    %c0_i32 = arith.constant 0 : i32
    return %arg0, %arg1 : i32, i32
  }
}

module attributes {stable_mosaic.version = 11 : i64} {
  func.func @_fc_sigmoid_kernel(%arg0: memref<8x256xf32, #tpu.memory_space<vmem>>, %arg1: memref<1x256xf32, #tpu.memory_space<vmem>>, %arg2: memref<1x1xf32, #tpu.memory_space<vmem>>, %arg3: memref<8x1xf32, #tpu.memory_space<vmem>>) attributes {dimension_semantics = [], scalar_prefetch = 0 : i64, scratch_operands = 0 : i64, tpu.core_type = #tpu.core_type<tc>} {
    %c0 = arith.constant 0 : index
    %c0_0 = arith.constant 0 : index
    %0 = vector.load %arg0[%c0, %c0_0] : memref<8x256xf32, #tpu.memory_space<vmem>>, vector<8x256xf32>
    %c0_1 = arith.constant 0 : index
    %c0_2 = arith.constant 0 : index
    %1 = vector.load %arg1[%c0_1, %c0_2] : memref<1x256xf32, #tpu.memory_space<vmem>>, vector<1x256xf32>
    %2 = vector.broadcast %1 : vector<1x256xf32> to vector<8x256xf32>
    %3 = arith.mulf %0, %2 : vector<8x256xf32>
    %cst = arith.constant dense<0.000000e+00> : vector<8xf32>
    %4 = vector.multi_reduction <add>, %3, %cst [1] : vector<8x256xf32> to vector<8xf32>
    %5 = vector.shape_cast %4 : vector<8xf32> to vector<8x1xf32>
    %c0_3 = arith.constant 0 : index
    %c0_4 = arith.constant 0 : index
    %6 = vector.load %arg2[%c0_3, %c0_4] : memref<1x1xf32, #tpu.memory_space<vmem>>, vector<1x1xf32>
    %7 = vector.broadcast %6 : vector<1x1xf32> to vector<8x1xf32>
    %8 = arith.addf %5, %7 : vector<8x1xf32>
    %9 = arith.negf %8 : vector<8x1xf32>
    %10 = math.exp %9 : vector<8x1xf32>
    %cst_5 = arith.constant 1.000000e+00 : f32
    %11 = vector.broadcast %cst_5 : f32 to vector<8x1xf32>
    %12 = arith.addf %11, %10 : vector<8x1xf32>
    %13 = arith.divf %11, %12 : vector<8x1xf32>
    %c0_6 = arith.constant 0 : index
    %c0_7 = arith.constant 0 : index
    %14 = vector.load %arg3[%c0_6, %c0_7] : memref<8x1xf32, #tpu.memory_space<vmem>>, vector<8x1xf32>
    tpu.vector_store %arg3[%c0_6, %c0_7], %13 {strides = array<i32>} : memref<8x1xf32, #tpu.memory_space<vmem>>, vector<8x1xf32>,
    return
  }
}

</mosaic_0001>

<bundles_post_ra>
// kernel: discriminator_forward.4
= control target key start
LH: loop header
LB: loop body
LE: loop exit
PB: predicated region body
PF: predicated region fallthrough
CT: control target
= control target key end

     0   :  { %8 = vsyncpa [#allocation3], 0  ;;  %s1266_s0 = inlined_call_operand.vmem [shape: f32[512,128], index: 0, kind: input, shape index: {}]   ;;  %s1267_s1 = inlined_call_operand.hbm [shape: f32[128,128], index: 1, kind: input, shape index: {}]   ;;  %s1268_s2 = inlined_call_operand.hbm [shape: f32[1,128], index: 2, kind: input, shape index: {}]   ;;  %s1269_s3 = inlined_call_operand.vmem [shape: f32[512,128], index: 3, kind: output, shape index: {}]  }
   0x1   :  { %9 = vsyncpa [#allocation5], 0  ;;  %s1076_s12 = smov 0   ;;  %s1078_s13 = smov 0  }
   0x2   :  { %s1080_s14 = smov 0  }
   0x3 LB: > { %s745_s15 = sadd.s32 4294967295, %s1050_s14   ;;  %s27_s16 = sadd.s32 1, %s1046_s13  ;;  %s1050_s14 = sphi %s1080_s14, %s15_s14   ;;  %s1046_s13 = sphi %s1078_s13, %s1274_s13   ;;  %s1042_s12 = sphi %s1076_s12, %s1273_s12  }
   0x4   : > { %p29_p0 = scmp.ge.s32.totalorder %s27_s16, 2  ;;  %p747_p1 = scmp.ge.s32.totalorder %s1050_s14, 1 }
   0x5   : > { %p138_p2 = scmp.lt.s32.totalorder %s1050_s14, 3  ;;  %p1101_p4 = scmp.eq.s32.totalorder %s745_s15, 0 }
   0x6   : > { %s1276_s16 = smov (%p29_p0, %s27_s16), 0  ;;  %s1052_s19 = smov [#allocation2]  }
   0x7   : > { %p1097_p3 = pnand %p747_p1, %p138_p2  ;;  %s152_s20 = sshll.u32 %s1052_s19, 4  ;;  %s153_s20 = int_to_ptr.vmem [resolvable:$true] %s152_s20 }
   0x8   : > { %s1053_s22 = smov [#allocation4]   ;;  %s979_s24 = scalar_lea.vmem %s153_s20, 2048 }
   0x9   : > { %p929_p5 = pneg %p1097_p3  ;;  %s168_s23 = sshll.u32 %s1053_s22, 4  ;;  %s169_s23 = int_to_ptr.vmem [resolvable:$true] %s168_s23 }
   0xa   : > { %p980_p8 = scmp.ne.s32.totalorder %s153_s20, %s979_s24  ;;  %p987_p11 = scmp.lt.s32.totalorder %s153_s20, %s153_s20 }
   0xb   : > { %p1109_p6 = pnand %p1101_p4, %p929_p5  ;;  %p988_p12 = scmp.lt.s32.totalorder %s979_s24, %s979_s24 }
   0xd   : > { %p970_p7 = pneg %p1109_p6  ;;  %p989_p13 = por %p988_p12, %p987_p11 }
   0xf   : > { %p982_p9 = pnand %p980_p8, %p970_p7 }
  0x11   : > { %p983_p10 = pneg %p982_p9 }
  0x13   : > { %p990_p0 = pnand %p989_p13, %p983_p10 }
  0x15   : > { %993 = shalt.err (!%p990_p0)
}
  0x16   : > { %s1054_s25 = smov 128   ;;  %s1055_s26 = smov 8  }
  0x17   : > { %932 = dma.hbm_to_vmem [thread:$0]  (!%p1109_p6), %s1267_s1, 2048, %s153_s20, [#allocation3], %s1054_s25, %s1054_s25, %s1055_s26  }
  0x18   : > { %s1005_s29 = scalar_lea.vmem %s169_s23, 16  ;;  %s1012_s30 = scalar_lea.vmem %s169_s23, 32 }
  0x19   : > { %p1006_p1 = scmp.ne.s32.totalorder %s169_s23, %s1005_s29  ;;  %p1013_p8 = scmp.lt.s32.totalorder %s169_s23, %s169_s23 }
  0x1a   : > { %p1014_p9 = scmp.lt.s32.totalorder %s1012_s30, %s1005_s29 }
  0x1b   : > { %p1008_p2 = pnand %p1006_p1, %p970_p7 }
  0x1c   : > { %p1015_p10 = por %p1014_p9, %p1013_p8 }
  0x1d   : > { %p1009_p5 = pneg %p1008_p2 }
  0x1f   : > { %p1016_p11 = pnand %p1015_p10, %p1009_p5 }
  0x21   : > { %1019 = shalt.err (!%p1016_p11)
}
  0x22   : > { %935 = dma.hbm_to_vmem [thread:$0]  (!%p1109_p6), %s1268_s2, 16, %s169_s23, [#allocation5]  }
  0x23   : > { %190 = sbr.rel (%p1097_p3) target bundleno = 307 (0x133), region = 32 }
  0x28   : > { %1033 = dma.done.wait (%p1101_p4), [#allocation3], 2048  }
  0x29   : > { %1035 = vsyncadd (%p1101_p4), [#allocation3], 4294965248 }
  0x2a   : > { %1037 = dma.done.wait (%p1101_p4), [#allocation5], 16  }
  0x2b   : > { %1039 = vsyncadd (%p1101_p4), [#allocation5], 4294967280  ;;  %v283_v0 = vld [vmem:[#allocation2 + $0x78] sm:$0xff]  ;;  %v282_v1 = vld [vmem:[#allocation2 + $0x70] sm:$0xff]  ;;  %s754_s6 = sshll.u32 %s1042_s12, 5 }
  0x2c   : > { %809 = vmatprep.subr.mxu0 %v283_v0  ;;  %889 = vmatprep.subr.mxu1 %v283_v0  ;;  %v281_v2 = vld [vmem:[#allocation2 + $0x68] sm:$0xff]  ;;  %v280_v3 = vld [vmem:[#allocation2 + $0x60] sm:$0xff]  ;;  %v279_v4 = vld [vmem:[#allocation2 + $0x58] sm:$0xff]  ;;  %p222_p3 = scmp.lt.s32.totalorder %s754_s6, 63 }
  0x2d   : > { %810 = vmatpush3.msra.mxu0 %v283_v0  ;;  %905 = vmatpush3.msra.mxu1 %v283_v0  ;;  %v278_v5 = vld [vmem:[#allocation2 + $0x50] sm:$0xff]  ;;  %v277_v6 = vld [vmem:[#allocation2 + $0x48] sm:$0xff]  ;;  %v276_v7 = vld [vmem:[#allocation2 + $0x40] sm:$0xff] }
  0x2e   : > { %811 = vmatprep.subr.mxu0 %v282_v1  ;;  %890 = vmatprep.subr.mxu1 %v282_v1  ;;  %v275_v8 = vld [vmem:[#allocation2 + $0x38] sm:$0xff]  ;;  %v274_v9 = vld [vmem:[#allocation2 + $0x30] sm:$0xff]  ;;  %v273_v10 = vld [vmem:[#allocation2 + $0x28] sm:$0xff]  ;;  %s1278_s6 = smov (!%p222_p3, %s754_s6), 63 }
  0x2f   : > { %812 = vmatpush3.msra.mxu0 %v282_v1  ;;  %906 = vmatpush3.msra.mxu1 %v282_v1  ;;  %v272_v11 = vld [vmem:[#allocation2 + $0x20] sm:$0xff]  ;;  %v271_v12 = vld [vmem:[#allocation2 + $0x18] sm:$0xff]  ;;  %v270_v13 = vld [vmem:[#allocation2 + $0x10] sm:$0xff]  ;;  %s755_s7 = sshll.u32 %s1278_s6, 3 }
  0x30   : > { %813 = vmatprep.subr.mxu0 %v281_v2  ;;  %891 = vmatprep.subr.mxu1 %v281_v2  ;;  %v269_v14 = vld [vmem:[#allocation2 + $0x8] sm:$0xff]  ;;  %s1150_s10 = scalar_lea.vmem %s1266_s0, %s755_s7  ;;  %v268_v15 = vld [vmem:[#allocation2] sm:$0xff]  ;;  %s1193_s15 = scalar_lea.vmem %s1269_s3, %s755_s7 }
  0x31   : > { %814 = vmatpush3.msra.mxu0 %v281_v2  ;;  %907 = vmatpush3.msra.mxu1 %v281_v2  ;;  %v236_v16 = vld [vmem:[%s1150_s10] sm:$0xff]  ;;  %v237_v18 = vld [vmem:[%s1150_s10 + $0x8] sm:$0xff]  ;;  %v238_v20 = vld [vmem:[%s1150_s10 + $0x10] sm:$0xff] }
  0x32   : > { %815 = vmatprep.subr.mxu0 %v280_v3  ;;  %892 = vmatprep.subr.mxu1 %v280_v3  ;;  %v252_v17 = vld [vmem:[%s1150_s10 + $0x80] sm:$0xff]  ;;  %v253_v19 = vld [vmem:[%s1150_s10 + $0x88] sm:$0xff]  ;;  %v254_v21 = vld [vmem:[%s1150_s10 + $0x90] sm:$0xff] }
  0x33   : > { %816 = vmatpush3.msra.mxu0 %v280_v3  ;;  %908 = vmatpush3.msra.mxu1 %v280_v3  ;;  %v239_v22 = vld [vmem:[%s1150_s10 + $0x18] sm:$0xff]  ;;  %v240_v24 = vld [vmem:[%s1150_s10 + $0x20] sm:$0xff]  ;;  %v241_v26 = vld [vmem:[%s1150_s10 + $0x28] sm:$0xff] }
  0x34   : > { %817 = vmatprep.subr.mxu0 %v279_v4  ;;  %893 = vmatprep.subr.mxu1 %v279_v4  ;;  %v255_v23 = vld [vmem:[%s1150_s10 + $0x98] sm:$0xff]  ;;  %v256_v25 = vld [vmem:[%s1150_s10 + $0xa0] sm:$0xff]  ;;  %v257_v27 = vld [vmem:[%s1150_s10 + $0xa8] sm:$0xff] }
  0x35   : > { %818 = vmatpush3.msra.mxu0 %v279_v4  ;;  %909 = vmatpush3.msra.mxu1 %v279_v4  ;;  %v242_v28 = vld [vmem:[%s1150_s10 + $0x30] sm:$0xff]  ;;  %v243_v30 = vld [vmem:[%s1150_s10 + $0x38] sm:$0xff]  ;;  %v244_v32 = vld [vmem:[%s1150_s10 + $0x40] sm:$0xff] }
  0x36   : > { %819 = vmatprep.subr.mxu0 %v278_v5  ;;  %894 = vmatprep.subr.mxu1 %v278_v5  ;;  %v258_v29 = vld [vmem:[%s1150_s10 + $0xb0] sm:$0xff]  ;;  %v259_v31 = vld [vmem:[%s1150_s10 + $0xb8] sm:$0xff]  ;;  %v260_v33 = vld [vmem:[%s1150_s10 + $0xc0] sm:$0xff] }
  0x37   : > { %820 = vmatpush3.msra.mxu0 %v278_v5  ;;  %910 = vmatpush3.msra.mxu1 %v278_v5  ;;  %v245_v34 = vld [vmem:[%s1150_s10 + $0x48] sm:$0xff]  ;;  %v246_v36 = vld [vmem:[%s1150_s10 + $0x50] sm:$0xff]  ;;  %v247_v38 = vld [vmem:[%s1150_s10 + $0x58] sm:$0xff] }
  0x38   : > { %821 = vmatprep.subr.mxu0 %v277_v6  ;;  %895 = vmatprep.subr.mxu1 %v277_v6  ;;  %v261_v35 = vld [vmem:[%s1150_s10 + $0xc8] sm:$0xff]  ;;  %v262_v37 = vld [vmem:[%s1150_s10 + $0xd0] sm:$0xff]  ;;  %v263_v39 = vld [vmem:[%s1150_s10 + $0xd8] sm:$0xff] }
  0x39   : > { %822 = vmatpush3.msra.mxu0 %v277_v6  ;;  %911 = vmatpush3.msra.mxu1 %v277_v6  ;;  %v248_v40 = vld [vmem:[%s1150_s10 + $0x60] sm:$0xff]  ;;  %v249_v42 = vld [vmem:[%s1150_s10 + $0x68] sm:$0xff]  ;;  %v250_v44 = vld [vmem:[%s1150_s10 + $0x70] sm:$0xff] }
  0x3a   : > { %823 = vmatprep.subr.mxu0 %v276_v7  ;;  %896 = vmatprep.subr.mxu1 %v276_v7  ;;  %v264_v41 = vld [vmem:[%s1150_s10 + $0xe0] sm:$0xff]  ;;  %v265_v43 = vld [vmem:[%s1150_s10 + $0xe8] sm:$0xff]  ;;  %v266_v45 = vld [vmem:[%s1150_s10 + $0xf0] sm:$0xff] }
  0x3b   : > { %824 = vmatpush3.msra.mxu0 %v276_v7  ;;  %912 = vmatpush3.msra.mxu1 %v276_v7  ;;  %v251_v46 = vld [vmem:[%s1150_s10 + $0x78] sm:$0xff]  ;;  %v1184_v48 = vld [vmem:[#allocation4] ss:$0 sm:$0xff] }
  0x3c   : > { %825 = vmatprep.subr.mxu0 %v275_v8  ;;  %897 = vmatprep.subr.mxu1 %v275_v8  ;;  %v267_v47 = vld [vmem:[%s1150_s10 + $0xf8] sm:$0xff] }
  0x3d   : > { %826 = vmatpush3.msra.mxu0 %v275_v8  ;;  %913 = vmatpush3.msra.mxu1 %v275_v8 }
  0x3e   : > { %827 = vmatprep.subr.mxu0 %v274_v9  ;;  %898 = vmatprep.subr.mxu1 %v274_v9 }
  0x3f   : > { %828 = vmatpush3.msra.mxu0 %v274_v9  ;;  %914 = vmatpush3.msra.mxu1 %v274_v9 }
  0x40   : > { %829 = vmatprep.subr.mxu0 %v273_v10  ;;  %899 = vmatprep.subr.mxu1 %v273_v10 }
  0x41   : > { %830 = vmatpush3.msra.mxu0 %v273_v10  ;;  %915 = vmatpush3.msra.mxu1 %v273_v10 }
  0x42   : > { %831 = vmatprep.subr.mxu0 %v272_v11  ;;  %900 = vmatprep.subr.mxu1 %v272_v11 }
  0x43   : > { %832 = vmatpush3.msra.mxu0 %v272_v11  ;;  %916 = vmatpush3.msra.mxu1 %v272_v11 }
  0x44   : > { %833 = vmatprep.subr.mxu0 %v271_v12  ;;  %901 = vmatprep.subr.mxu1 %v271_v12 }
  0x45   : > { %834 = vmatpush3.msra.mxu0 %v271_v12  ;;  %917 = vmatpush3.msra.mxu1 %v271_v12 }
  0x46   : > { %835 = vmatprep.subr.mxu0 %v270_v13  ;;  %902 = vmatprep.subr.mxu1 %v270_v13 }
  0x47   : > { %836 = vmatpush3.msra.mxu0 %v270_v13  ;;  %918 = vmatpush3.msra.mxu1 %v270_v13 }
  0x48   : > { %837 = vmatprep.subr.mxu0 %v269_v14  ;;  %903 = vmatprep.subr.mxu1 %v269_v14 }
  0x49   : > { %838 = vmatpush3.msra.mxu0 %v269_v14  ;;  %919 = vmatpush3.msra.mxu1 %v269_v14 }
  0x4a   : > { %839 = vmatprep.subr.mxu0 %v268_v15  ;;  %904 = vmatprep.subr.mxu1 %v268_v15 }
  0x4b   : > { %840 = vmatpush3.msra.mxu0 %v268_v15  ;;  %920 = vmatpush3.msra.mxu1 %v268_v15 }
  0x4c   : > { %841 = vmatprep.mubr.f32.mxu0 %v236_v16  ;;  %865 = vmatprep.mubr.f32.mxu1 %v252_v17 }
  0x4d   : > { %842 = vmatmul.mubr.f32.vlgmr.msra.gmra.mxu0 %v237_v18  ;;  %866 = vmatmul.mubr.f32.vlgmr.msra.gmra.mxu1 %v253_v19 }
  0x4e   : > { %844 = vmatprep.mubr.f32.mxu0 %v238_v20  ;;  %868 = vmatprep.mubr.f32.mxu1 %v254_v21 }
  0x51   : > { %845 = vmatmul.mubr.f32.gmra.mxu0 %v239_v22  ;;  %869 = vmatmul.mubr.f32.gmra.mxu1 %v255_v23 }
  0x52   : > { %847 = vmatprep.mubr.f32.mxu0 %v240_v24  ;;  %871 = vmatprep.mubr.f32.mxu1 %v256_v25 }
  0x55   : > { %848 = vmatmul.mubr.f32.gmra.mxu0 %v241_v26  ;;  %872 = vmatmul.mubr.f32.gmra.mxu1 %v257_v27 }
  0x56   : > { %850 = vmatprep.mubr.f32.mxu0 %v242_v28  ;;  %874 = vmatprep.mubr.f32.mxu1 %v258_v29 }
  0x59   : > { %851 = vmatmul.mubr.f32.gmra.mxu0 %v243_v30  ;;  %875 = vmatmul.mubr.f32.gmra.mxu1 %v259_v31 }
  0x5a   : > { %853 = vmatprep.mubr.f32.mxu0 %v244_v32  ;;  %877 = vmatprep.mubr.f32.mxu1 %v260_v33 }
  0x5d   : > { %854 = vmatmul.mubr.f32.gmra.mxu0 %v245_v34  ;;  %878 = vmatmul.mubr.f32.gmra.mxu1 %v261_v35 }
  0x5e   : > { %856 = vmatprep.mubr.f32.mxu0 %v246_v36  ;;  %880 = vmatprep.mubr.f32.mxu1 %v262_v37 }
  0x61   : > { %857 = vmatmul.mubr.f32.gmra.mxu0 %v247_v38  ;;  %881 = vmatmul.mubr.f32.gmra.mxu1 %v263_v39 }
  0x62   : > { %859 = vmatprep.mubr.f32.mxu0 %v248_v40  ;;  %883 = vmatprep.mubr.f32.mxu1 %v264_v41 }
  0x65   : > { %860 = vmatmul.mubr.f32.gmra.mxu0 %v249_v42  ;;  %884 = vmatmul.mubr.f32.gmra.mxu1 %v265_v43 }
  0x66   : > { %862 = vmatprep.mubr.f32.mxu0 %v250_v44  ;;  %886 = vmatprep.mubr.f32.mxu1 %v266_v45 }
  0x69   : > { %863 = vmatmul.mubr.f32.gmra.mxu0 %v251_v46  ;;  %887 = vmatmul.mubr.f32.gmra.mxu1 %v267_v47 }
 0x10d   : > { %v843_v49 = vpop.f32.mrf.mxu0  ;;  %v867_v50 = vpop.f32.mrf.mxu1 }
 0x10e   : > { %v363_v51 = vadd.f32 %v843_v49, %v1184_v48  ;;  %v443_v52 = vadd.f32 %v867_v50, %v1184_v48 }
 0x10f   : > { %v357_v53 = vpop.f32.mrf.mxu0  ;;  %v437_v54 = vpop.f32.mrf.mxu1 }
 0x110   : > { %vm517_vm0 = vcmp.gt.f32.partialorder %v363_v51, 0.0  ;;  %v549_v55 = vmul.f32 0.2, %v363_v51  ;;  %vm533_vm1 = vcmp.gt.f32.partialorder %v443_v52, 0.0  ;;  %v565_v56 = vmul.f32 0.2, %v443_v52 }
 0x111   : > { %v358_v57 = vadd.f32 %v1184_v48, %v357_v53  ;;  %v438_v58 = vadd.f32 %v1184_v48, %v437_v54  ;;  %v846_v59 = vpop.f32.mrf.mxu0  ;;  %v870_v60 = vpop.f32.mrf.mxu1 }
 0x112   : > { %v581_v61 = vsel %vm517_vm0, %v363_v51, %v549_v55  ;;  %v597_v62 = vsel %vm533_vm1, %v443_v52, %v565_v56  ;;  %v373_v63 = vadd.f32 %v846_v59, %v1184_v48  ;;  %v453_v0 = vadd.f32 %v870_v60, %v1184_v48 }
 0x113   : > { %613 = vst [vmem:[%s1193_s15 + $0x8] sm:$0xff] %v581_v61  ;;  %629 = vst [vmem:[%s1193_s15 + $0x88] sm:$0xff] %v597_v62  ;;  %vm516_vm2 = vcmp.gt.f32.partialorder %v358_v57, 0.0  ;;  %v548_v1 = vmul.f32 0.2, %v358_v57  ;;  %vm532_vm3 = vcmp.gt.f32.partialorder %v438_v58, 0.0  ;;  %v367_v3 = vpop.f32.mrf.mxu0  ;;  %v447_v4 = vpop.f32.mrf.mxu1 }
 0x114   : > { %v564_v2 = vmul.f32 0.2, %v438_v58  ;;  %vm519_vm4 = vcmp.gt.f32.partialorder %v373_v63, 0.0  ;;  %v551_v5 = vmul.f32 0.2, %v373_v63  ;;  %vm535_vm5 = vcmp.gt.f32.partialorder %v453_v0, 0.0 }
 0x115   : > { %v567_v6 = vmul.f32 0.2, %v453_v0  ;;  %v580_v7 = vsel %vm516_vm2, %v358_v57, %v548_v1  ;;  %v368_v9 = vadd.f32 %v1184_v48, %v367_v3  ;;  %v448_v10 = vadd.f32 %v1184_v48, %v447_v4  ;;  %v849_v11 = vpop.f32.mrf.mxu0  ;;  %v873_v12 = vpop.f32.mrf.mxu1 }
 0x116   : > { %v596_v8 = vsel %vm532_vm3, %v438_v58, %v564_v2  ;;  %612 = vst [vmem:[%s1193_s15] sm:$0xff] %v580_v7  ;;  %v583_v13 = vsel %vm519_vm4, %v373_v63, %v551_v5  ;;  %v383_v15 = vadd.f32 %v849_v11, %v1184_v48  ;;  %v463_v16 = vadd.f32 %v873_v12, %v1184_v48 }
 0x117   : > { %628 = vst [vmem:[%s1193_s15 + $0x80] sm:$0xff] %v596_v8  ;;  %v599_v14 = vsel %vm535_vm5, %v453_v0, %v567_v6  ;;  %615 = vst [vmem:[%s1193_s15 + $0x18] sm:$0xff] %v583_v13  ;;  %vm518_vm6 = vcmp.gt.f32.partialorder %v368_v9, 0.0  ;;  %v550_v17 = vmul.f32 0.2, %v368_v9  ;;  %vm534_vm7 = vcmp.gt.f32.partialorder %v448_v10, 0.0  ;;  %v377_v19 = vpop.f32.mrf.mxu0  ;;  %v457_v20 = vpop.f32.mrf.mxu1 }
 0x118   : > { %631 = vst [vmem:[%s1193_s15 + $0x98] sm:$0xff] %v599_v14  ;;  %v566_v18 = vmul.f32 0.2, %v448_v10  ;;  %vm521_vm8 = vcmp.gt.f32.partialorder %v383_v15, 0.0  ;;  %v553_v21 = vmul.f32 0.2, %v383_v15  ;;  %v378_v25 = vadd.f32 %v1184_v48, %v377_v19 }
 0x119   : > { %vm537_vm9 = vcmp.gt.f32.partialorder %v463_v16, 0.0  ;;  %v569_v22 = vmul.f32 0.2, %v463_v16  ;;  %v582_v23 = vsel %vm518_vm6, %v368_v9, %v550_v17  ;;  %v458_v26 = vadd.f32 %v1184_v48, %v457_v20  ;;  %v852_v27 = vpop.f32.mrf.mxu0  ;;  %v876_v28 = vpop.f32.mrf.mxu1 }
 0x11a   : > { %v598_v24 = vsel %vm534_vm7, %v448_v10, %v566_v18  ;;  %614 = vst [vmem:[%s1193_s15 + $0x10] sm:$0xff] %v582_v23  ;;  %v585_v29 = vsel %vm521_vm8, %v383_v15, %v553_v21  ;;  %v393_v31 = vadd.f32 %v852_v27, %v1184_v48  ;;  %v473_v32 = vadd.f32 %v876_v28, %v1184_v48 }
 0x11b   : > { %630 = vst [vmem:[%s1193_s15 + $0x90] sm:$0xff] %v598_v24  ;;  %v601_v30 = vsel %vm537_vm9, %v463_v16, %v569_v22  ;;  %617 = vst [vmem:[%s1193_s15 + $0x28] sm:$0xff] %v585_v29  ;;  %vm520_vm10 = vcmp.gt.f32.partialorder %v378_v25, 0.0  ;;  %v552_v33 = vmul.f32 0.2, %v378_v25  ;;  %vm536_vm11 = vcmp.gt.f32.partialorder %v458_v26, 0.0  ;;  %v387_v35 = vpop.f32.mrf.mxu0  ;;  %v467_v36 = vpop.f32.mrf.mxu1 }
 0x11c   : > { %633 = vst [vmem:[%s1193_s15 + $0xa8] sm:$0xff] %v601_v30  ;;  %v568_v34 = vmul.f32 0.2, %v458_v26  ;;  %vm523_vm12 = vcmp.gt.f32.partialorder %v393_v31, 0.0  ;;  %v555_v37 = vmul.f32 0.2, %v393_v31  ;;  %v388_v41 = vadd.f32 %v1184_v48, %v387_v35 }
 0x11d   : > { %vm539_vm13 = vcmp.gt.f32.partialorder %v473_v32, 0.0  ;;  %v571_v38 = vmul.f32 0.2, %v473_v32  ;;  %v584_v39 = vsel %vm520_vm10, %v378_v25, %v552_v33  ;;  %v468_v42 = vadd.f32 %v1184_v48, %v467_v36  ;;  %v855_v43 = vpop.f32.mrf.mxu0  ;;  %v879_v44 = vpop.f32.mrf.mxu1 }
 0x11e   : > { %v600_v40 = vsel %vm536_vm11, %v458_v26, %v568_v34  ;;  %616 = vst [vmem:[%s1193_s15 + $0x20] sm:$0xff] %v584_v39  ;;  %v587_v45 = vsel %vm523_vm12, %v393_v31, %v555_v37  ;;  %v403_v47 = vadd.f32 %v855_v43, %v1184_v48  ;;  %v483_v49 = vadd.f32 %v879_v44, %v1184_v48 }
 0x11f   : > { %632 = vst [vmem:[%s1193_s15 + $0xa0] sm:$0xff] %v600_v40  ;;  %v603_v46 = vsel %vm539_vm13, %v473_v32, %v571_v38  ;;  %619 = vst [vmem:[%s1193_s15 + $0x38] sm:$0xff] %v587_v45  ;;  %vm522_vm14 = vcmp.gt.f32.partialorder %v388_v41, 0.0  ;;  %v554_v50 = vmul.f32 0.2, %v388_v41  ;;  %vm538_vm15 = vcmp.gt.f32.partialorder %v468_v42, 0.0  ;;  %v397_v52 = vpop.f32.mrf.mxu0  ;;  %v477_v53 = vpop.f32.mrf.mxu1 }
 0x120   : > { %635 = vst [vmem:[%s1193_s15 + $0xb8] sm:$0xff] %v603_v46  ;;  %v570_v51 = vmul.f32 0.2, %v468_v42  ;;  %vm525_vm0 = vcmp.gt.f32.partialorder %v403_v47, 0.0  ;;  %v557_v54 = vmul.f32 0.2, %v403_v47  ;;  %v398_v58 = vadd.f32 %v1184_v48, %v397_v52 }
 0x121   : > { %vm541_vm1 = vcmp.gt.f32.partialorder %v483_v49, 0.0  ;;  %v573_v55 = vmul.f32 0.2, %v483_v49  ;;  %v586_v56 = vsel %vm522_vm14, %v388_v41, %v554_v50  ;;  %v478_v59 = vadd.f32 %v1184_v48, %v477_v53  ;;  %v858_v60 = vpop.f32.mrf.mxu0  ;;  %v882_v61 = vpop.f32.mrf.mxu1 }
 0x122   : > { %v602_v57 = vsel %vm538_vm15, %v468_v42, %v570_v51  ;;  %618 = vst [vmem:[%s1193_s15 + $0x30] sm:$0xff] %v586_v56  ;;  %v589_v62 = vsel %vm525_vm0, %v403_v47, %v557_v54  ;;  %v413_v0 = vadd.f32 %v858_v60, %v1184_v48  ;;  %v493_v1 = vadd.f32 %v882_v61, %v1184_v48 }
 0x123   : > { %634 = vst [vmem:[%s1193_s15 + $0xb0] sm:$0xff] %v602_v57  ;;  %v605_v63 = vsel %vm541_vm1, %v483_v49, %v573_v55  ;;  %621 = vst [vmem:[%s1193_s15 + $0x48] sm:$0xff] %v589_v62  ;;  %vm524_vm2 = vcmp.gt.f32.partialorder %v398_v58, 0.0  ;;  %v556_v2 = vmul.f32 0.2, %v398_v58  ;;  %vm540_vm3 = vcmp.gt.f32.partialorder %v478_v59, 0.0  ;;  %v407_v4 = vpop.f32.mrf.mxu0  ;;  %v487_v5 = vpop.f32.mrf.mxu1 }
 0x124   : > { %637 = vst [vmem:[%s1193_s15 + $0xc8] sm:$0xff] %v605_v63  ;;  %v572_v3 = vmul.f32 0.2, %v478_v59  ;;  %vm527_vm4 = vcmp.gt.f32.partialorder %v413_v0, 0.0  ;;  %v559_v6 = vmul.f32 0.2, %v413_v0  ;;  %v408_v10 = vadd.f32 %v1184_v48, %v407_v4 }
 0x125   : > { %vm543_vm5 = vcmp.gt.f32.partialorder %v493_v1, 0.0  ;;  %v575_v7 = vmul.f32 0.2, %v493_v1  ;;  %v588_v8 = vsel %vm524_vm2, %v398_v58, %v556_v2  ;;  %v488_v11 = vadd.f32 %v1184_v48, %v487_v5  ;;  %v861_v12 = vpop.f32.mrf.mxu0  ;;  %v885_v13 = vpop.f32.mrf.mxu1 }
 0x126   : > { %v604_v9 = vsel %vm540_vm3, %v478_v59, %v572_v3  ;;  %620 = vst [vmem:[%s1193_s15 + $0x40] sm:$0xff] %v588_v8  ;;  %v591_v14 = vsel %vm527_vm4, %v413_v0, %v559_v6  ;;  %v423_v16 = vadd.f32 %v861_v12, %v1184_v48  ;;  %v503_v17 = vadd.f32 %v885_v13, %v1184_v48 }
 0x127   : > { %636 = vst [vmem:[%s1193_s15 + $0xc0] sm:$0xff] %v604_v9  ;;  %v607_v15 = vsel %vm543_vm5, %v493_v1, %v575_v7  ;;  %623 = vst [vmem:[%s1193_s15 + $0x58] sm:$0xff] %v591_v14  ;;  %vm526_vm6 = vcmp.gt.f32.partialorder %v408_v10, 0.0  ;;  %v558_v18 = vmul.f32 0.2, %v408_v10  ;;  %vm542_vm7 = vcmp.gt.f32.partialorder %v488_v11, 0.0  ;;  %v417_v20 = vpop.f32.mrf.mxu0  ;;  %v497_v21 = vpop.f32.mrf.mxu1 }
 0x128   : > { %639 = vst [vmem:[%s1193_s15 + $0xd8] sm:$0xff] %v607_v15  ;;  %v574_v19 = vmul.f32 0.2, %v488_v11  ;;  %vm529_vm8 = vcmp.gt.f32.partialorder %v423_v16, 0.0  ;;  %v561_v22 = vmul.f32 0.2, %v423_v16  ;;  %v418_v26 = vadd.f32 %v1184_v48, %v417_v20 }
 0x129   : > { %vm545_vm9 = vcmp.gt.f32.partialorder %v503_v17, 0.0  ;;  %v577_v23 = vmul.f32 0.2, %v503_v17  ;;  %v590_v24 = vsel %vm526_vm6, %v408_v10, %v558_v18  ;;  %v498_v27 = vadd.f32 %v1184_v48, %v497_v21  ;;  %v864_v28 = vpop.f32.mrf.mxu0  ;;  %v888_v29 = vpop.f32.mrf.mxu1 }
 0x12a   : > { %v606_v25 = vsel %vm542_vm7, %v488_v11, %v574_v19  ;;  %622 = vst [vmem:[%s1193_s15 + $0x50] sm:$0xff] %v590_v24  ;;  %v593_v30 = vsel %vm529_vm8, %v423_v16, %v561_v22  ;;  %v433_v32 = vadd.f32 %v864_v28, %v1184_v48  ;;  %v513_v33 = vadd.f32 %v888_v29, %v1184_v48 }
 0x12b   : > { %638 = vst [vmem:[%s1193_s15 + $0xd0] sm:$0xff] %v606_v25  ;;  %v609_v31 = vsel %vm545_vm9, %v503_v17, %v577_v23  ;;  %625 = vst [vmem:[%s1193_s15 + $0x68] sm:$0xff] %v593_v30  ;;  %vm528_vm10 = vcmp.gt.f32.partialorder %v418_v26, 0.0  ;;  %v560_v34 = vmul.f32 0.2, %v418_v26  ;;  %vm544_vm11 = vcmp.gt.f32.partialorder %v498_v27, 0.0  ;;  %v427_v36 = vpop.f32.mrf.mxu0  ;;  %v507_v37 = vpop.f32.mrf.mxu1 }
 0x12c   : > { %641 = vst [vmem:[%s1193_s15 + $0xe8] sm:$0xff] %v609_v31  ;;  %v576_v35 = vmul.f32 0.2, %v498_v27  ;;  %vm531_vm12 = vcmp.gt.f32.partialorder %v433_v32, 0.0  ;;  %v563_v38 = vmul.f32 0.2, %v433_v32  ;;  %v428_v42 = vadd.f32 %v1184_v48, %v427_v36 }
 0x12d   : > { %vm547_vm13 = vcmp.gt.f32.partialorder %v513_v33, 0.0  ;;  %v579_v39 = vmul.f32 0.2, %v513_v33  ;;  %v592_v40 = vsel %vm528_vm10, %v418_v26, %v560_v34  ;;  %v508_v43 = vadd.f32 %v1184_v48, %v507_v37 }
 0x12e   : > { %v608_v41 = vsel %vm544_vm11, %v498_v27, %v576_v35  ;;  %624 = vst [vmem:[%s1193_s15 + $0x60] sm:$0xff] %v592_v40  ;;  %v595_v44 = vsel %vm531_vm12, %v433_v32, %v563_v38  ;;  %vm530_vm14 = vcmp.gt.f32.partialorder %v428_v42, 0.0  ;;  %v562_v46 = vmul.f32 0.2, %v428_v42 }
 0x12f   : > { %640 = vst [vmem:[%s1193_s15 + $0xe0] sm:$0xff] %v608_v41  ;;  %v611_v45 = vsel %vm547_vm13, %v513_v33, %v579_v39  ;;  %627 = vst [vmem:[%s1193_s15 + $0x78] sm:$0xff] %v595_v44  ;;  %vm546_vm15 = vcmp.gt.f32.partialorder %v508_v43, 0.0  ;;  %v578_v47 = vmul.f32 0.2, %v508_v43 }
 0x130   : > { %643 = vst [vmem:[%s1193_s15 + $0xf8] sm:$0xff] %v611_v45  ;;  %v594_v49 = vsel %vm530_vm14, %v428_v42, %v562_v46 }
 0x131   : > { %v610_v50 = vsel %vm546_vm15, %v508_v43, %v578_v47  ;;  %626 = vst [vmem:[%s1193_s15 + $0x70] sm:$0xff] %v594_v49 }
 0x132   : > { %642 = vst [vmem:[%s1193_s15 + $0xf0] sm:$0xff] %v610_v50 }
 0x133 PF: > { %s15_s14 = sadd.s32 1, %s1050_s14   ;;  %s1273_s12 = smov %s1046_s13 }
 0x134   : > { %p12_p4 = scmp.ge.s32.totalorder %s15_s14, 4   ;;  %s1274_s13 = smov %s1276_s16 }
 0x136   :  { %14 = sbr.rel (!%p12_p4) target bundleno = 3 (0x3), region = 73 }
 0x13b   :  { %672 = vsyncpa [#allocation3], 1 }
 0x13c   :  { %674 = vsyncpa [#allocation3 + $0x1], 1 }
 0x13d   :  { %675 = vsyncpa [#allocation5], 1 }

// kernel: discriminator_forward.5
= control target key start
LH: loop header
LB: loop body
LE: loop exit
PB: predicated region body
PF: predicated region fallthrough
CT: control target
= control target key end

     0   :  { %vm754_vm0 = vmmov 0   ;;  %s1253_s1 = inlined_call_operand.vmem [shape: f32[640,128], index: 1, kind: input, shape index: {}]   ;;  %s1254_s0 = inlined_call_operand.vmem [shape: f32[72,640], index: 0, kind: input, shape index: {}]   ;;  %s1255_s2 = inlined_call_operand.vmem [shape: f32[1,128], index: 2, kind: input, shape index: {}]   ;;  %s1256_s3 = inlined_call_operand.vmem [shape: f32[72,128], index: 3, kind: output, shape index: {}]  }
   0x1   :  { %v90_v0 = vld [vmem:[%s1253_s1 + $0xf8] sm:$0xff]  ;;  %v89_v4 = vld [vmem:[%s1253_s1 + $0xf0] sm:$0xff]  ;;  %v88_v8 = vld [vmem:[%s1253_s1 + $0xe8] sm:$0xff] }
   0x2   :  { %v122_v1 = vld [vmem:[%s1253_s1 + $0x1f8] sm:$0xff]  ;;  %517 = vmatprep.subr.mxu0 %v90_v0  ;;  %v121_v5 = vld [vmem:[%s1253_s1 + $0x1f0] sm:$0xff]  ;;  %v120_v9 = vld [vmem:[%s1253_s1 + $0x1e8] sm:$0xff] }
   0x3   :  { %v74_v2 = vld [vmem:[%s1253_s1 + $0x78] sm:$0xff]  ;;  %576 = vmatprep.subr.mxu1 %v122_v1  ;;  %v73_v6 = vld [vmem:[%s1253_s1 + $0x70] sm:$0xff]  ;;  %v72_v10 = vld [vmem:[%s1253_s1 + $0x68] sm:$0xff] }
   0x4   :  { %v106_v3 = vld [vmem:[%s1253_s1 + $0x178] sm:$0xff]  ;;  %518 = vmatpush3.msra.mxu0 %v74_v2  ;;  %v105_v7 = vld [vmem:[%s1253_s1 + $0x170] sm:$0xff]  ;;  %v104_v11 = vld [vmem:[%s1253_s1 + $0x168] sm:$0xff] }
   0x5   :  { %577 = vmatpush3.msra.mxu1 %v106_v3  ;;  %519 = vmatprep.subr.mxu0 %v89_v4  ;;  %v87_v12 = vld [vmem:[%s1253_s1 + $0xe0] sm:$0xff]  ;;  %v86_v16 = vld [vmem:[%s1253_s1 + $0xd8] sm:$0xff]  ;;  %v85_v20 = vld [vmem:[%s1253_s1 + $0xd0] sm:$0xff] }
   0x6   :  { %578 = vmatprep.subr.mxu1 %v121_v5  ;;  %520 = vmatpush3.msra.mxu0 %v73_v6  ;;  %v119_v13 = vld [vmem:[%s1253_s1 + $0x1e0] sm:$0xff]  ;;  %v118_v17 = vld [vmem:[%s1253_s1 + $0x1d8] sm:$0xff]  ;;  %v117_v21 = vld [vmem:[%s1253_s1 + $0x1d0] sm:$0xff] }
   0x7   :  { %579 = vmatpush3.msra.mxu1 %v105_v7  ;;  %521 = vmatprep.subr.mxu0 %v88_v8  ;;  %v71_v14 = vld [vmem:[%s1253_s1 + $0x60] sm:$0xff]  ;;  %v70_v18 = vld [vmem:[%s1253_s1 + $0x58] sm:$0xff]  ;;  %v69_v22 = vld [vmem:[%s1253_s1 + $0x50] sm:$0xff]  ;;  %v753_v7 = vmov 0.0  }
   0x8   :  { %580 = vmatprep.subr.mxu1 %v120_v9  ;;  %v103_v15 = vld [vmem:[%s1253_s1 + $0x160] sm:$0xff]  ;;  %522 = vmatpush3.msra.mxu0 %v72_v10  ;;  %v102_v19 = vld [vmem:[%s1253_s1 + $0x158] sm:$0xff]  ;;  %v101_v23 = vld [vmem:[%s1253_s1 + $0x150] sm:$0xff] }
   0x9   :  { %581 = vmatpush3.msra.mxu1 %v104_v11  ;;  %523 = vmatprep.subr.mxu0 %v87_v12  ;;  %v84_v24 = vld [vmem:[%s1253_s1 + $0xc8] sm:$0xff]  ;;  %v83_v28 = vld [vmem:[%s1253_s1 + $0xc0] sm:$0xff]  ;;  %v82_v32 = vld [vmem:[%s1253_s1 + $0xb8] sm:$0xff] }
   0xa   :  { %582 = vmatprep.subr.mxu1 %v119_v13  ;;  %524 = vmatpush3.msra.mxu0 %v71_v14  ;;  %v116_v25 = vld [vmem:[%s1253_s1 + $0x1c8] sm:$0xff]  ;;  %v115_v29 = vld [vmem:[%s1253_s1 + $0x1c0] sm:$0xff]  ;;  %v114_v33 = vld [vmem:[%s1253_s1 + $0x1b8] sm:$0xff] }
   0xb   :  { %583 = vmatpush3.msra.mxu1 %v103_v15  ;;  %525 = vmatprep.subr.mxu0 %v86_v16  ;;  %v68_v26 = vld [vmem:[%s1253_s1 + $0x48] sm:$0xff]  ;;  %v67_v30 = vld [vmem:[%s1253_s1 + $0x40] sm:$0xff]  ;;  %v66_v34 = vld [vmem:[%s1253_s1 + $0x38] sm:$0xff] }
   0xc   :  { %584 = vmatprep.subr.mxu1 %v118_v17  ;;  %526 = vmatpush3.msra.mxu0 %v70_v18  ;;  %v100_v27 = vld [vmem:[%s1253_s1 + $0x148] sm:$0xff]  ;;  %v99_v31 = vld [vmem:[%s1253_s1 + $0x140] sm:$0xff]  ;;  %v98_v35 = vld [vmem:[%s1253_s1 + $0x138] sm:$0xff] }
   0xd   :  { %585 = vmatpush3.msra.mxu1 %v102_v19  ;;  %527 = vmatprep.subr.mxu0 %v85_v20  ;;  %v81_v36 = vld [vmem:[%s1253_s1 + $0xb0] sm:$0xff]  ;;  %v80_v40 = vld [vmem:[%s1253_s1 + $0xa8] sm:$0xff]  ;;  %v79_v44 = vld [vmem:[%s1253_s1 + $0xa0] sm:$0xff] }
   0xe   :  { %586 = vmatprep.subr.mxu1 %v117_v21  ;;  %528 = vmatpush3.msra.mxu0 %v69_v22  ;;  %v113_v37 = vld [vmem:[%s1253_s1 + $0x1b0] sm:$0xff]  ;;  %v112_v41 = vld [vmem:[%s1253_s1 + $0x1a8] sm:$0xff]  ;;  %v111_v45 = vld [vmem:[%s1253_s1 + $0x1a0] sm:$0xff] }
   0xf   :  { %587 = vmatpush3.msra.mxu1 %v101_v23  ;;  %529 = vmatprep.subr.mxu0 %v84_v24  ;;  %v65_v38 = vld [vmem:[%s1253_s1 + $0x30] sm:$0xff]  ;;  %v64_v42 = vld [vmem:[%s1253_s1 + $0x28] sm:$0xff]  ;;  %v63_v46 = vld [vmem:[%s1253_s1 + $0x20] sm:$0xff] }
  0x10   :  { %588 = vmatprep.subr.mxu1 %v116_v25  ;;  %530 = vmatpush3.msra.mxu0 %v68_v26  ;;  %v97_v39 = vld [vmem:[%s1253_s1 + $0x130] sm:$0xff]  ;;  %v96_v43 = vld [vmem:[%s1253_s1 + $0x128] sm:$0xff]  ;;  %v95_v47 = vld [vmem:[%s1253_s1 + $0x120] sm:$0xff] }
  0x11   :  { %589 = vmatpush3.msra.mxu1 %v100_v27  ;;  %531 = vmatprep.subr.mxu0 %v83_v28  ;;  %v78_v48 = vld [vmem:[%s1253_s1 + $0x98] sm:$0xff]  ;;  %v77_v52 = vld [vmem:[%s1253_s1 + $0x90] sm:$0xff]  ;;  %v76_v56 = vld [vmem:[%s1253_s1 + $0x88] sm:$0xff] }
  0x12   :  { %590 = vmatprep.subr.mxu1 %v115_v29  ;;  %532 = vmatpush3.msra.mxu0 %v67_v30  ;;  %v110_v49 = vld [vmem:[%s1253_s1 + $0x198] sm:$0xff]  ;;  %v109_v53 = vld [vmem:[%s1253_s1 + $0x190] sm:$0xff]  ;;  %v108_v57 = vld [vmem:[%s1253_s1 + $0x188] sm:$0xff] }
  0x13   :  { %591 = vmatpush3.msra.mxu1 %v99_v31  ;;  %533 = vmatprep.subr.mxu0 %v82_v32  ;;  %v62_v50 = vld [vmem:[%s1253_s1 + $0x18] sm:$0xff]  ;;  %v61_v54 = vld [vmem:[%s1253_s1 + $0x10] sm:$0xff]  ;;  %v60_v58 = vld [vmem:[%s1253_s1 + $0x8] sm:$0xff] }
  0x14   :  { %592 = vmatprep.subr.mxu1 %v114_v33  ;;  %534 = vmatpush3.msra.mxu0 %v66_v34  ;;  %v94_v51 = vld [vmem:[%s1253_s1 + $0x118] sm:$0xff]  ;;  %v93_v55 = vld [vmem:[%s1253_s1 + $0x110] sm:$0xff]  ;;  %v92_v59 = vld [vmem:[%s1253_s1 + $0x108] sm:$0xff] }
  0x15   :  { %593 = vmatpush3.msra.mxu1 %v98_v35  ;;  %535 = vmatprep.subr.mxu0 %v81_v36  ;;  %v75_v60 = vld [vmem:[%s1253_s1 + $0x80] sm:$0xff]  ;;  %v15_v63 = vld [vmem:[%s1254_s0 + $0x8] sm:$0xff]  ;;  %v17_v1 = vld [vmem:[%s1254_s0 + $0x18] sm:$0xff] }
  0x16   :  { %594 = vmatprep.subr.mxu1 %v113_v37  ;;  %536 = vmatpush3.msra.mxu0 %v65_v38  ;;  %v107_v61 = vld [vmem:[%s1253_s1 + $0x180] sm:$0xff]  ;;  %v16_v3 = vld [vmem:[%s1254_s0 + $0x10] sm:$0xff]  ;;  %v138_v5 = vld [vmem:[%s1253_s1 + $0x278] sm:$0xff] }
  0x17   :  { %595 = vmatpush3.msra.mxu1 %v97_v39  ;;  %537 = vmatprep.subr.mxu0 %v80_v40  ;;  %v59_v62 = vld [vmem:[%s1253_s1] sm:$0xff]  ;;  %v20_v4 = vld [vmem:[%s1254_s0 + $0x30] sm:$0xff]  ;;  %v19_v8 = vld [vmem:[%s1254_s0 + $0x28] sm:$0xff] }
  0x18   :  { %596 = vmatprep.subr.mxu1 %v112_v41  ;;  %538 = vmatpush3.msra.mxu0 %v64_v42  ;;  %v91_v0 = vld [vmem:[%s1253_s1 + $0x100] sm:$0xff]  ;;  %v21_v9 = vld [vmem:[%s1254_s0 + $0x38] sm:$0xff]  ;;  %v137_v10 = vld [vmem:[%s1253_s1 + $0x270] sm:$0xff] }
  0x19   :  { %597 = vmatpush3.msra.mxu1 %v96_v43  ;;  %539 = vmatprep.subr.mxu0 %v79_v44  ;;  %v14_v2 = vld [vmem:[%s1254_s0] sm:$0xff]  ;;  %v136_v11 = vld [vmem:[%s1253_s1 + $0x268] sm:$0xff]  ;;  %v25_v12 = vld [vmem:[%s1254_s0 + $0x58] sm:$0xff] }
  0x1a   :  { %598 = vmatprep.subr.mxu1 %v111_v45  ;;  %540 = vmatpush3.msra.mxu0 %v63_v46  ;;  %v22_v6 = vld [vmem:[%s1254_s0 + $0x40] sm:$0xff]  ;;  %v27_v13 = vld [vmem:[%s1254_s0 + $0x68] sm:$0xff]  ;;  %v24_v14 = vld [vmem:[%s1254_s0 + $0x50] sm:$0xff] }
  0x1b   :  { %599 = vmatpush3.msra.mxu1 %v95_v47  ;;  %541 = vmatprep.subr.mxu0 %v78_v48  ;;  %v26_v15 = vld [vmem:[%s1254_s0 + $0x60] sm:$0xff]  ;;  %v134_v17 = vld [vmem:[%s1253_s1 + $0x258] sm:$0xff]  ;;  %v32_v19 = vld [vmem:[%s1254_s0 + $0x90] sm:$0xff] }
  0x1c   :  { %600 = vmatprep.subr.mxu1 %v110_v49  ;;  %542 = vmatpush3.msra.mxu0 %v62_v50  ;;  %v135_v16 = vld [vmem:[%s1253_s1 + $0x260] sm:$0xff]  ;;  %v29_v20 = vld [vmem:[%s1254_s0 + $0x78] sm:$0xff]  ;;  %v31_v21 = vld [vmem:[%s1254_s0 + $0x88] sm:$0xff] }
  0x1d   :  { %601 = vmatpush3.msra.mxu1 %v94_v51  ;;  %543 = vmatprep.subr.mxu0 %v77_v52  ;;  %v30_v18 = vld [vmem:[%s1254_s0 + $0x80] sm:$0xff]  ;;  %v133_v22 = vld [vmem:[%s1253_s1 + $0x250] sm:$0xff]  ;;  %v35_v23 = vld [vmem:[%s1254_s0 + $0xa8] sm:$0xff] }
  0x1e   :  { %602 = vmatprep.subr.mxu1 %v109_v53  ;;  %544 = vmatpush3.msra.mxu0 %v61_v54  ;;  %v37_v24 = vld [vmem:[%s1254_s0 + $0xb8] sm:$0xff]  ;;  %v132_v25 = vld [vmem:[%s1253_s1 + $0x248] sm:$0xff]  ;;  %v34_v26 = vld [vmem:[%s1254_s0 + $0xa0] sm:$0xff] }
  0x1f   :  { %603 = vmatpush3.msra.mxu1 %v93_v55  ;;  %545 = vmatprep.subr.mxu0 %v76_v56  ;;  %v36_v27 = vld [vmem:[%s1254_s0 + $0xb0] sm:$0xff]  ;;  %v131_v28 = vld [vmem:[%s1253_s1 + $0x240] sm:$0xff]  ;;  %v130_v31 = vld [vmem:[%s1253_s1 + $0x238] sm:$0xff] }
  0x20   :  { %604 = vmatprep.subr.mxu1 %v108_v57  ;;  %546 = vmatpush3.msra.mxu0 %v60_v58  ;;  %v40_v29 = vld [vmem:[%s1254_s0 + $0xd0] sm:$0xff]  ;;  %v42_v30 = vld [vmem:[%s1254_s0 + $0xe0] sm:$0xff]  ;;  %v39_v32 = vld [vmem:[%s1254_s0 + $0xc8] sm:$0xff] }
  0x21   :  { %605 = vmatpush3.msra.mxu1 %v92_v59  ;;  %547 = vmatprep.subr.mxu0 %v75_v60  ;;  %v41_v33 = vld [vmem:[%s1254_s0 + $0xd8] sm:$0xff]  ;;  %v129_v34 = vld [vmem:[%s1253_s1 + $0x230] sm:$0xff]  ;;  %v47_v36 = vld [vmem:[%s1254_s0 + $0x108] sm:$0xff] }
  0x22   :  { %606 = vmatprep.subr.mxu1 %v107_v61  ;;  %548 = vmatpush3.msra.mxu0 %v59_v62  ;;  %v45_v35 = vld [vmem:[%s1254_s0 + $0xf8] sm:$0xff]  ;;  %v44_v37 = vld [vmem:[%s1254_s0 + $0xf0] sm:$0xff]  ;;  %v46_v38 = vld [vmem:[%s1254_s0 + $0x100] sm:$0xff] }
  0x23   :  { %210 = vmatprep.mubr.f32.mxu0 %v15_v63  ;;  %607 = vmatpush3.msra.mxu1 %v91_v0  ;;  %v128_v39 = vld [vmem:[%s1253_s1 + $0x228] sm:$0xff]  ;;  %v127_v40 = vld [vmem:[%s1253_s1 + $0x220] sm:$0xff]  ;;  %v52_v42 = vld [vmem:[%s1254_s0 + $0x130] sm:$0xff] }
  0x24   :  { %320 = vmatprep.mubr.f32.mxu1 %v17_v1  ;;  %211 = vmatmul.mubr.f32.vlgmr.msra.gmra.mxu0 %v14_v2  ;;  %v50_v41 = vld [vmem:[%s1254_s0 + $0x120] sm:$0xff]  ;;  %v49_v43 = vld [vmem:[%s1254_s0 + $0x118] sm:$0xff]  ;;  %v51_v44 = vld [vmem:[%s1254_s0 + $0x128] sm:$0xff] }
  0x25   :  { %321 = vmatmul.mubr.f32.vlgmr.msra.gmra.mxu1 %v16_v3  ;;  %660 = vmatprep.subr.mxu0 %v753_v7  ;;  %v126_v45 = vld [vmem:[%s1253_s1 + $0x218] sm:$0xff]  ;;  %v55_v46 = vld [vmem:[%s1254_s0 + $0x148] sm:$0xff]  ;;  %v125_v48 = vld [vmem:[%s1253_s1 + $0x210] sm:$0xff] }
  0x26   :  { %215 = vmatprep.mubr.f32.mxu0 %v20_v4  ;;  %661 = vmatpush3.msra.mxu0 %v138_v5  ;;  %v57_v47 = vld [vmem:[%s1254_s0 + $0x158] sm:$0xff]  ;;  %v54_v49 = vld [vmem:[%s1254_s0 + $0x140] sm:$0xff]  ;;  %v56_v50 = vld [vmem:[%s1254_s0 + $0x150] sm:$0xff] }
  0x27   :  { %325 = vmatprep.mubr.f32.mxu1 %v22_v6  ;;  %662 = vmatprep.subr.mxu0 %v753_v7  ;;  %v124_v51 = vld [vmem:[%s1253_s1 + $0x208] sm:$0xff]  ;;  %v123_v52 = vld [vmem:[%s1253_s1 + $0x200] sm:$0xff]  ;;  %v48_v56 = vld [vmem:[%s1254_s0 + $0x110] sm:$0xff] }
  0x28   :  { %719 = vmatprep.subr.mxu1 %v753_v7  ;;  %216 = vmatmul.mubr.f32.gmra.mxu0 %v19_v8  ;;  %v18_v53 = vld [vmem:[%s1254_s0 + $0x20] sm:$0xff]  ;;  %v43_v54 = vld [vmem:[%s1254_s0 + $0xe8] sm:$0xff]  ;;  %v28_v57 = vld [vmem:[%s1254_s0 + $0x70] sm:$0xff] }
  0x29   :  { %326 = vmatmul.mubr.f32.gmra.mxu1 %v21_v9  ;;  %663 = vmatpush3.msra.mxu0 %v137_v10  ;;  %v23_v55 = vld [vmem:[%s1254_s0 + $0x48] sm:$0xff]  ;;  %v53_v58 = vld [vmem:[%s1254_s0 + $0x138] sm:$0xff]  ;;  %v58_v60 = vld [vmem:[%s1254_s0 + $0x160] sm:$0xff] }
  0x2a   :  { %735 = vmatpush3.msra.mxu1 %v138_v5  ;;  %664 = vmatprep.subr.mxu0 %v753_v7  ;;  %v33_v59 = vld [vmem:[%s1254_s0 + $0x98] sm:$0xff]  ;;  %v38_v61 = vld [vmem:[%s1254_s0 + $0xc0] sm:$0xff] }
  0x2b   :  { %720 = vmatprep.subr.mxu1 %v753_v7  ;;  %665 = vmatpush3.msra.mxu0 %v136_v11 }
  0x2c   :  { %220 = vmatprep.mubr.f32.mxu0 %v25_v12  ;;  %330 = vmatprep.mubr.f32.mxu1 %v27_v13 }
  0x2d   :  { %736 = vmatpush3.msra.mxu1 %v137_v10  ;;  %666 = vmatprep.subr.mxu0 %v753_v7 }
  0x2e   :  { %221 = vmatmul.mubr.f32.gmra.mxu0 %v24_v14  ;;  %331 = vmatmul.mubr.f32.gmra.mxu1 %v26_v15 }
  0x2f   :  { %721 = vmatprep.subr.mxu1 %v753_v7  ;;  %667 = vmatpush3.msra.mxu0 %v135_v16 }
  0x30   :  { %737 = vmatpush3.msra.mxu1 %v136_v11  ;;  %668 = vmatprep.subr.mxu0 %v753_v7 }
  0x31   :  { %722 = vmatprep.subr.mxu1 %v753_v7  ;;  %669 = vmatpush3.msra.mxu0 %v134_v17 }
  0x32   :  { %225 = vmatprep.mubr.f32.mxu0 %v30_v18  ;;  %335 = vmatprep.mubr.f32.mxu1 %v32_v19 }
  0x33   :  { %738 = vmatpush3.msra.mxu1 %v135_v16  ;;  %226 = vmatmul.mubr.f32.gmra.mxu0 %v29_v20 }
  0x34   :  { %336 = vmatmul.mubr.f32.gmra.mxu1 %v31_v21  ;;  %723 = vmatprep.subr.mxu1 %v753_v7 }
  0x35   :  { %670 = vmatprep.subr.mxu0 %v753_v7  ;;  %739 = vmatpush3.msra.mxu1 %v134_v17 }
  0x36   :  { %671 = vmatpush3.msra.mxu0 %v133_v22  ;;  %724 = vmatprep.subr.mxu1 %v753_v7 }
  0x37   :  { %672 = vmatprep.subr.mxu0 %v753_v7  ;;  %230 = vmatprep.mubr.f32.mxu0 %v35_v23 }
  0x38   :  { %340 = vmatprep.mubr.f32.mxu1 %v37_v24  ;;  %740 = vmatpush3.msra.mxu1 %v133_v22 }
  0x39   :  { %673 = vmatpush3.msra.mxu0 %v132_v25  ;;  %341 = vmatmul.mubr.f32.gmra.mxu1 %v36_v27 }
  0x3a   :  { %231 = vmatmul.mubr.f32.gmra.mxu0 %v34_v26  ;;  %725 = vmatprep.subr.mxu1 %v753_v7 }
  0x3b   :  { %674 = vmatprep.subr.mxu0 %v753_v7  ;;  %741 = vmatpush3.msra.mxu1 %v132_v25 }
  0x3c   :  { %675 = vmatpush3.msra.mxu0 %v131_v28  ;;  %726 = vmatprep.subr.mxu1 %v753_v7 }
  0x3d   :  { %676 = vmatprep.subr.mxu0 %v753_v7  ;;  %235 = vmatprep.mubr.f32.mxu0 %v40_v29 }
  0x3e   :  { %345 = vmatprep.mubr.f32.mxu1 %v42_v30  ;;  %742 = vmatpush3.msra.mxu1 %v131_v28 }
  0x3f   :  { %677 = vmatpush3.msra.mxu0 %v130_v31  ;;  %346 = vmatmul.mubr.f32.gmra.mxu1 %v41_v33 }
  0x40   :  { %236 = vmatmul.mubr.f32.gmra.mxu0 %v39_v32  ;;  %727 = vmatprep.subr.mxu1 %v753_v7  ;;  %v1211_v32 = vld [vmem:[%s1255_s2] ss:$0 sm:$0xff] }
  0x41   :  { %678 = vmatprep.subr.mxu0 %v753_v7  ;;  %743 = vmatpush3.msra.mxu1 %v130_v31 }
  0x42   :  { %679 = vmatpush3.msra.mxu0 %v129_v34  ;;  %728 = vmatprep.subr.mxu1 %v753_v7 }
  0x43   :  { %240 = vmatprep.mubr.f32.mxu0 %v45_v35  ;;  %350 = vmatprep.mubr.f32.mxu1 %v47_v36 }
  0x44   :  { %744 = vmatpush3.msra.mxu1 %v129_v34  ;;  %680 = vmatprep.subr.mxu0 %v753_v7 }
  0x45   :  { %241 = vmatmul.mubr.f32.gmra.mxu0 %v44_v37  ;;  %351 = vmatmul.mubr.f32.gmra.mxu1 %v46_v38 }
  0x46   :  { %729 = vmatprep.subr.mxu1 %v753_v7  ;;  %681 = vmatpush3.msra.mxu0 %v128_v39 }
  0x47   :  { %745 = vmatpush3.msra.mxu1 %v128_v39  ;;  %682 = vmatprep.subr.mxu0 %v753_v7 }
  0x48   :  { %730 = vmatprep.subr.mxu1 %v753_v7  ;;  %683 = vmatpush3.msra.mxu0 %v127_v40 }
  0x49   :  { %245 = vmatprep.mubr.f32.mxu0 %v50_v41  ;;  %355 = vmatprep.mubr.f32.mxu1 %v52_v42 }
  0x4a   :  { %746 = vmatpush3.msra.mxu1 %v127_v40  ;;  %684 = vmatprep.subr.mxu0 %v753_v7 }
  0x4b   :  { %246 = vmatmul.mubr.f32.gmra.mxu0 %v49_v43  ;;  %356 = vmatmul.mubr.f32.gmra.mxu1 %v51_v44 }
  0x4c   :  { %731 = vmatprep.subr.mxu1 %v753_v7  ;;  %685 = vmatpush3.msra.mxu0 %v126_v45 }
  0x4d   :  { %747 = vmatpush3.msra.mxu1 %v126_v45  ;;  %686 = vmatprep.subr.mxu0 %v753_v7 }
  0x4e   :  { %732 = vmatprep.subr.mxu1 %v753_v7  ;;  %250 = vmatprep.mubr.f32.mxu0 %v55_v46 }
  0x4f   :  { %360 = vmatprep.mubr.f32.mxu1 %v57_v47  ;;  %687 = vmatpush3.msra.mxu0 %v125_v48 }
  0x50   :  { %748 = vmatpush3.msra.mxu1 %v125_v48  ;;  %251 = vmatmul.mubr.f32.gmra.mxu0 %v54_v49 }
  0x51   :  { %361 = vmatmul.mubr.f32.gmra.mxu1 %v56_v50  ;;  %688 = vmatprep.subr.mxu0 %v753_v7 }
  0x52   :  { %733 = vmatprep.subr.mxu1 %v753_v7  ;;  %689 = vmatpush3.msra.mxu0 %v124_v51 }
  0x53   :  { %749 = vmatpush3.msra.mxu1 %v124_v51  ;;  %690 = vmatprep.subr.mxu0 %v753_v7 }
  0x54   :  { %734 = vmatprep.subr.mxu1 %v753_v7  ;;  %691 = vmatpush3.msra.mxu0 %v123_v52 }
  0x55   :  { %750 = vmatpush3.msra.mxu1 %v123_v52  ;;  %692 = vmatprep.mubr.msk.f32.mxu0 %vm754_vm0, %v753_v7 }
  0x56   :  { %707 = vmatprep.mubr.msk.f32.mxu1 %vm754_vm0, %v753_v7  ;;  %693 = vmatmul.mubr.f32.vlgmr.msra.gmra.mxu0 %v18_v53 }
  0x57   :  { %708 = vmatmul.mubr.f32.vlgmr.msra.gmra.mxu1 %v43_v54  ;;  %695 = vmatprep.mubr.msk.f32.mxu0 %vm754_vm0, %v753_v7 }
  0x58   :  { %710 = vmatprep.mubr.msk.f32.mxu1 %vm754_vm0, %v753_v7 }
  0x5a   :  { %696 = vmatmul.mubr.f32.gmra.mxu0 %v23_v55 }
  0x5b   :  { %711 = vmatmul.mubr.f32.gmra.mxu1 %v48_v56  ;;  %698 = vmatprep.mubr.msk.f32.mxu0 %vm754_vm0, %v753_v7 }
  0x5c   :  { %713 = vmatprep.mubr.msk.f32.mxu1 %vm754_vm0, %v753_v7 }
  0x5e   :  { %699 = vmatmul.mubr.f32.gmra.mxu0 %v28_v57 }
  0x5f   :  { %714 = vmatmul.mubr.f32.gmra.mxu1 %v53_v58  ;;  %701 = vmatprep.mubr.msk.f32.mxu0 %vm754_vm0, %v753_v7 }
  0x60   :  { %716 = vmatprep.mubr.msk.f32.mxu1 %vm754_vm0, %v753_v7 }
  0x62   :  { %702 = vmatmul.mubr.f32.gmra.mxu0 %v33_v59 }
  0x63   :  { %717 = vmatmul.mubr.f32.gmra.mxu1 %v58_v60  ;;  %704 = vmatprep.mubr.msk.f32.mxu0 %vm754_vm0, %v753_v7 }
  0x66   :  { %705 = vmatmul.mubr.f32.gmra.mxu0 %v38_v61 }
  0xe4   :  { %v549_v62 = vpop.f32.mrf.mxu0 }
  0xe5   :  { %v608_v63 = vpop.f32.mrf.mxu1 }
  0xe6   :  { %v550_v0 = vpop.f32.mrf.mxu0 }
  0xe7   :  { %v609_v1 = vpop.f32.mrf.mxu1  ;;  %v551_v29 = vadd.f32 %v550_v0, %v549_v62 }
  0xe8   :  { %v552_v2 = vpop.f32.mrf.mxu0  ;;  %v610_v38 = vadd.f32 %v609_v1, %v608_v63 }
  0xe9   :  { %v611_v3 = vpop.f32.mrf.mxu1  ;;  %v213_v37 = vadd.f32 %v551_v29, %v1211_v32 }
  0xea   :  { %v553_v4 = vpop.f32.mrf.mxu0 }
  0xeb   :  { %v612_v5 = vpop.f32.mrf.mxu1  ;;  %v554_v33 = vadd.f32 %v553_v4, %v552_v2  ;;  %v323_v49 = vadd.f32 %v610_v38, %v213_v37 }
  0xec   :  { %v613_v45 = vadd.f32 %v612_v5, %v611_v3 }
  0xed   :  { %v218_v44 = vadd.f32 %v554_v33, %v1211_v32 }
  0xee   :  { %v555_v6 = vpop.f32.mrf.mxu0  ;;  %v614_v8 = vpop.f32.mrf.mxu1 }
  0xef   :  { %v328_v58 = vadd.f32 %v613_v45, %v218_v44 }
  0xf0   :  { %v556_v9 = vpop.f32.mrf.mxu0  ;;  %v615_v10 = vpop.f32.mrf.mxu1 }
  0xf1   :  { %v557_v41 = vadd.f32 %v556_v9, %v555_v6  ;;  %v616_v52 = vadd.f32 %v615_v10, %v614_v8 }
  0xf3   :  { %v558_v11 = vpop.f32.mrf.mxu0  ;;  %v223_v51 = vadd.f32 %v557_v41, %v1211_v32 }
  0xf4   :  { %v617_v12 = vpop.f32.mrf.mxu1 }
  0xf5   :  { %v559_v7 = vpop.f32.mrf.mxu0  ;;  %v333_v8 = vadd.f32 %v616_v52, %v223_v51 }
  0xf6   :  { %v618_v13 = vpop.f32.mrf.mxu1  ;;  %v560_v53 = vadd.f32 %v559_v7, %v558_v11 }
  0xf7   :  { %v619_v4 = vadd.f32 %v618_v13, %v617_v12 }
  0xf8   :  { %v228_v3 = vadd.f32 %v560_v53, %v1211_v32 }
  0xf9   :  { %v1202_v15 = vpop.f32.mrf.mxu1 }
  0xfa   :  { %v1200_v14 = vpop.f32.mrf.mxu0  ;;  %v338_v33 = vadd.f32 %v619_v4, %v228_v3 }
  0xfb   :  { %v1206_v17 = vpop.f32.mrf.mxu1 }
  0xfc   :  { %v1204_v16 = vpop.f32.mrf.mxu0  ;;  %v622_v29 = vadd.f32 %v1206_v17, %v1202_v15 }
  0xff   :  { %v623_v19 = vpop.f32.mrf.mxu1 }
 0x100   :  { %v564_v18 = vpop.f32.mrf.mxu0 }
 0x101   :  { %v624_v21 = vpop.f32.mrf.mxu1 }
 0x102   :  { %v565_v20 = vpop.f32.mrf.mxu0  ;;  %v625_v40 = vadd.f32 %v624_v21, %v623_v19 }
 0x103   :  { %v566_v30 = vadd.f32 %v565_v20, %v564_v18  ;;  %v563_v18 = vadd.f32 %v1204_v16, %v1200_v14 }
 0x105   :  { %v567_v22 = vpop.f32.mrf.mxu0  ;;  %v626_v23 = vpop.f32.mrf.mxu1  ;;  %v238_v39 = vadd.f32 %v566_v30, %v1211_v32 }
 0x107   :  { %v568_v24 = vpop.f32.mrf.mxu0  ;;  %v627_v25 = vpop.f32.mrf.mxu1  ;;  %v348_v50 = vadd.f32 %v625_v40, %v238_v39 }
 0x108   :  { %v569_v34 = vadd.f32 %v568_v24, %v567_v22  ;;  %v628_v47 = vadd.f32 %v627_v25, %v626_v23 }
 0x10a   :  { %v243_v46 = vadd.f32 %v569_v34, %v1211_v32 }
 0x10b   :  { %v570_v26 = vpop.f32.mrf.mxu0  ;;  %v629_v27 = vpop.f32.mrf.mxu1 }
 0x10c   :  { %v353_v0 = vadd.f32 %v628_v47, %v243_v46 }
 0x10d   :  { %v571_v28 = vpop.f32.mrf.mxu0  ;;  %v630_v31 = vpop.f32.mrf.mxu1 }
 0x10e   :  { %v572_v48 = vadd.f32 %v571_v28, %v570_v26  ;;  %v631_v60 = vadd.f32 %v630_v31, %v629_v27  ;;  %v233_v28 = vadd.f32 %v563_v18, %v1211_v32 }
 0x110   :  { %v573_v35 = vpop.f32.mrf.mxu0  ;;  %v248_v59 = vadd.f32 %v572_v48, %v1211_v32  ;;  %v343_v41 = vadd.f32 %v622_v29, %v233_v28 }
 0x111   :  { %v632_v36 = vpop.f32.mrf.mxu1 }
 0x112   :  { %v574_v42 = vpop.f32.mrf.mxu0  ;;  %v358_v21 = vadd.f32 %v631_v60, %v248_v59 }
 0x113   :  { %v633_v43 = vpop.f32.mrf.mxu1  ;;  %v575_v61 = vadd.f32 %v574_v42, %v573_v35 }
 0x114   :  { %v634_v20 = vadd.f32 %v633_v43, %v632_v36 }
 0x115   :  { %v253_v19 = vadd.f32 %v575_v61, %v1211_v32 }
 0x116   :  { %v432_v54 = vpop.f32.mrf.mxu0 }
 0x117   :  { %v457_v55 = vpop.f32.mrf.mxu1  ;;  %v433_v56 = vadd.f32 %v432_v54, %v323_v49  ;;  %v363_v34 = vadd.f32 %v634_v20, %v253_v19 }
 0x118   :  { %v458_v57 = vadd.f32 %v457_v55, %v348_v50  ;;  %v694_v62 = vpop.f32.mrf.mxu0 }
 0x119   :  { %v709_v63 = vpop.f32.mrf.mxu1  ;;  %vm476_vm1 = vcmp.gt.f32.partialorder %v433_v56, 0.0  ;;  %v485_v1 = vmul.f32 0.2, %v433_v56 }
 0x11a   :  { %vm481_vm2 = vcmp.gt.f32.partialorder %v458_v57, 0.0  ;;  %v490_v2 = vmul.f32 0.2, %v458_v57  ;;  %v437_v5 = vpop.f32.mrf.mxu0 }
 0x11b   :  { %v462_v6 = vpop.f32.mrf.mxu1  ;;  %v494_v9 = vsel %vm476_vm1, %v433_v56, %v485_v1  ;;  %v438_v11 = vadd.f32 %v437_v5, %v328_v58 }
 0x11c   :  { %v499_v10 = vsel %vm481_vm2, %v458_v57, %v490_v2  ;;  %v463_v7 = vadd.f32 %v462_v6, %v353_v0  ;;  %503 = vst [vmem:[%s1256_s3] sm:$0xff] %v494_v9  ;;  %v697_v12 = vpop.f32.mrf.mxu0 }
 0x11d   :  { %508 = vst [vmem:[%s1256_s3 + $0x28] sm:$0xff] %v499_v10  ;;  %v712_v13 = vpop.f32.mrf.mxu1  ;;  %vm477_vm3 = vcmp.gt.f32.partialorder %v438_v11, 0.0  ;;  %v486_v22 = vmul.f32 0.2, %v438_v11 }
 0x11e   :  { %vm482_vm4 = vcmp.gt.f32.partialorder %v463_v7, 0.0  ;;  %v491_v23 = vmul.f32 0.2, %v463_v7  ;;  %v442_v24 = vpop.f32.mrf.mxu0 }
 0x11f   :  { %v467_v14 = vpop.f32.mrf.mxu1  ;;  %v495_v16 = vsel %vm477_vm3, %v438_v11, %v486_v22  ;;  %v443_v26 = vadd.f32 %v442_v24, %v333_v8 }
 0x120   :  { %v500_v25 = vsel %vm482_vm4, %v463_v7, %v491_v23  ;;  %v468_v27 = vadd.f32 %v467_v14, %v358_v21  ;;  %504 = vst [vmem:[%s1256_s3 + $0x8] sm:$0xff] %v495_v16  ;;  %v700_v30 = vpop.f32.mrf.mxu0 }
 0x121   :  { %509 = vst [vmem:[%s1256_s3 + $0x30] sm:$0xff] %v500_v25  ;;  %v715_v31 = vpop.f32.mrf.mxu1  ;;  %vm478_vm5 = vcmp.gt.f32.partialorder %v443_v26, 0.0  ;;  %v487_v35 = vmul.f32 0.2, %v443_v26 }
 0x122   :  { %vm483_vm6 = vcmp.gt.f32.partialorder %v468_v27, 0.0  ;;  %v492_v36 = vmul.f32 0.2, %v468_v27  ;;  %v447_v32 = vpop.f32.mrf.mxu0 }
 0x123   :  { %v472_v37 = vpop.f32.mrf.mxu1  ;;  %v496_v38 = vsel %vm478_vm5, %v443_v26, %v487_v35  ;;  %v448_v17 = vadd.f32 %v447_v32, %v338_v33 }
 0x124   :  { %v501_v15 = vsel %vm483_vm6, %v468_v27, %v492_v36  ;;  %v473_v39 = vadd.f32 %v472_v37, %v363_v34  ;;  %505 = vst [vmem:[%s1256_s3 + $0x10] sm:$0xff] %v496_v38  ;;  %v703_v40 = vpop.f32.mrf.mxu0 }
 0x125   :  { %510 = vst [vmem:[%s1256_s3 + $0x38] sm:$0xff] %v501_v15  ;;  %v718_v42 = vpop.f32.mrf.mxu1  ;;  %vm479_vm7 = vcmp.gt.f32.partialorder %v448_v17, 0.0  ;;  %v488_v43 = vmul.f32 0.2, %v448_v17 }
 0x126   :  { %vm484_vm8 = vcmp.gt.f32.partialorder %v473_v39, 0.0  ;;  %v493_v44 = vmul.f32 0.2, %v473_v39  ;;  %v452_v45 = vpop.f32.mrf.mxu0 }
 0x127   :  { %v497_v46 = vsel %vm479_vm7, %v448_v17, %v488_v43  ;;  %v453_v48 = vadd.f32 %v452_v45, %v343_v41 }
 0x128   :  { %v502_v47 = vsel %vm484_vm8, %v473_v39, %v493_v44  ;;  %506 = vst [vmem:[%s1256_s3 + $0x18] sm:$0xff] %v497_v46  ;;  %v706_v49 = vpop.f32.mrf.mxu0 }
 0x129   :  { %511 = vst [vmem:[%s1256_s3 + $0x40] sm:$0xff] %v502_v47  ;;  %vm480_vm9 = vcmp.gt.f32.partialorder %v453_v48, 0.0  ;;  %v489_v50 = vmul.f32 0.2, %v453_v48 }
 0x12b   :  { %v498_v51 = vsel %vm480_vm9, %v453_v48, %v489_v50 }
 0x12c   :  { %507 = vst [vmem:[%s1256_s3 + $0x20] sm:$0xff] %v498_v51 }

// kernel: discriminator_forward.6
= control target key start
LH: loop header
LB: loop body
LE: loop exit
PB: predicated region body
PF: predicated region fallthrough
CT: control target
= control target key end

     0   :  { %vm450_vm0 = vmmov 0   ;;  %s732_s1 = inlined_call_operand.vmem [shape: f32[640,128], index: 1, kind: input, shape index: {}]   ;;  %s733_s0 = inlined_call_operand.vmem [shape: f32[8,640], index: 0, kind: input, shape index: {}]   ;;  %s734_s2 = inlined_call_operand.vmem [shape: f32[1,128], index: 2, kind: input, shape index: {}]   ;;  %s735_s3 = inlined_call_operand.vmem [shape: f32[8,128], index: 3, kind: output, shape index: {}]  }
   0x1   :  { %v50_v0 = vld [vmem:[%s732_s1 + $0xf8] sm:$0xff]  ;;  %v49_v2 = vld [vmem:[%s732_s1 + $0xf0] sm:$0xff]  ;;  %v48_v6 = vld [vmem:[%s732_s1 + $0xe8] sm:$0xff] }
   0x2   :  { %v34_v1 = vld [vmem:[%s732_s1 + $0x78] sm:$0xff]  ;;  %325 = vmatprep.subr.mxu0 %v50_v0  ;;  %v33_v4 = vld [vmem:[%s732_s1 + $0x70] sm:$0xff]  ;;  %v32_v8 = vld [vmem:[%s732_s1 + $0x68] sm:$0xff] }
   0x3   :  { %v82_v3 = vld [vmem:[%s732_s1 + $0x1f8] sm:$0xff]  ;;  %326 = vmatpush3.msra.mxu0 %v34_v1  ;;  %v81_v7 = vld [vmem:[%s732_s1 + $0x1f0] sm:$0xff]  ;;  %v80_v10 = vld [vmem:[%s732_s1 + $0x1e8] sm:$0xff] }
   0x4   :  { %v66_v5 = vld [vmem:[%s732_s1 + $0x178] sm:$0xff]  ;;  %360 = vmatprep.subr.mxu1 %v82_v3  ;;  %327 = vmatprep.subr.mxu0 %v49_v2  ;;  %v65_v9 = vld [vmem:[%s732_s1 + $0x170] sm:$0xff]  ;;  %v47_v11 = vld [vmem:[%s732_s1 + $0xe0] sm:$0xff] }
   0x5   :  { %361 = vmatpush3.msra.mxu1 %v66_v5  ;;  %328 = vmatpush3.msra.mxu0 %v33_v4  ;;  %v64_v12 = vld [vmem:[%s732_s1 + $0x168] sm:$0xff]  ;;  %v31_v13 = vld [vmem:[%s732_s1 + $0x60] sm:$0xff]  ;;  %v46_v15 = vld [vmem:[%s732_s1 + $0xd8] sm:$0xff]  ;;  %v449_v5 = vmov 0.0  }
   0x6   :  { %362 = vmatprep.subr.mxu1 %v81_v7  ;;  %329 = vmatprep.subr.mxu0 %v48_v6  ;;  %v79_v14 = vld [vmem:[%s732_s1 + $0x1e0] sm:$0xff]  ;;  %v30_v17 = vld [vmem:[%s732_s1 + $0x58] sm:$0xff]  ;;  %v45_v19 = vld [vmem:[%s732_s1 + $0xd0] sm:$0xff] }
   0x7   :  { %363 = vmatpush3.msra.mxu1 %v65_v9  ;;  %330 = vmatpush3.msra.mxu0 %v32_v8  ;;  %v63_v16 = vld [vmem:[%s732_s1 + $0x160] sm:$0xff]  ;;  %v78_v18 = vld [vmem:[%s732_s1 + $0x1d8] sm:$0xff]  ;;  %v29_v21 = vld [vmem:[%s732_s1 + $0x50] sm:$0xff] }
   0x8   :  { %364 = vmatprep.subr.mxu1 %v80_v10  ;;  %331 = vmatprep.subr.mxu0 %v47_v11  ;;  %v62_v20 = vld [vmem:[%s732_s1 + $0x158] sm:$0xff]  ;;  %v77_v22 = vld [vmem:[%s732_s1 + $0x1d0] sm:$0xff]  ;;  %v44_v23 = vld [vmem:[%s732_s1 + $0xc8] sm:$0xff] }
   0x9   :  { %365 = vmatpush3.msra.mxu1 %v64_v12  ;;  %332 = vmatpush3.msra.mxu0 %v31_v13  ;;  %v61_v24 = vld [vmem:[%s732_s1 + $0x150] sm:$0xff]  ;;  %v28_v25 = vld [vmem:[%s732_s1 + $0x48] sm:$0xff]  ;;  %v43_v27 = vld [vmem:[%s732_s1 + $0xc0] sm:$0xff] }
   0xa   :  { %366 = vmatprep.subr.mxu1 %v79_v14  ;;  %333 = vmatprep.subr.mxu0 %v46_v15  ;;  %v76_v26 = vld [vmem:[%s732_s1 + $0x1c8] sm:$0xff]  ;;  %v27_v29 = vld [vmem:[%s732_s1 + $0x40] sm:$0xff]  ;;  %v42_v31 = vld [vmem:[%s732_s1 + $0xb8] sm:$0xff] }
   0xb   :  { %367 = vmatpush3.msra.mxu1 %v63_v16  ;;  %334 = vmatpush3.msra.mxu0 %v30_v17  ;;  %v60_v28 = vld [vmem:[%s732_s1 + $0x148] sm:$0xff]  ;;  %v75_v30 = vld [vmem:[%s732_s1 + $0x1c0] sm:$0xff]  ;;  %v26_v33 = vld [vmem:[%s732_s1 + $0x38] sm:$0xff] }
   0xc   :  { %368 = vmatprep.subr.mxu1 %v78_v18  ;;  %335 = vmatprep.subr.mxu0 %v45_v19  ;;  %v59_v32 = vld [vmem:[%s732_s1 + $0x140] sm:$0xff]  ;;  %v74_v34 = vld [vmem:[%s732_s1 + $0x1b8] sm:$0xff]  ;;  %v41_v35 = vld [vmem:[%s732_s1 + $0xb0] sm:$0xff] }
   0xd   :  { %369 = vmatpush3.msra.mxu1 %v62_v20  ;;  %336 = vmatpush3.msra.mxu0 %v29_v21  ;;  %v58_v36 = vld [vmem:[%s732_s1 + $0x138] sm:$0xff]  ;;  %v25_v37 = vld [vmem:[%s732_s1 + $0x30] sm:$0xff]  ;;  %v40_v39 = vld [vmem:[%s732_s1 + $0xa8] sm:$0xff] }
   0xe   :  { %370 = vmatprep.subr.mxu1 %v77_v22  ;;  %337 = vmatprep.subr.mxu0 %v44_v23  ;;  %v73_v38 = vld [vmem:[%s732_s1 + $0x1b0] sm:$0xff]  ;;  %v24_v41 = vld [vmem:[%s732_s1 + $0x28] sm:$0xff]  ;;  %v39_v43 = vld [vmem:[%s732_s1 + $0xa0] sm:$0xff] }
   0xf   :  { %371 = vmatpush3.msra.mxu1 %v61_v24  ;;  %338 = vmatpush3.msra.mxu0 %v28_v25  ;;  %v57_v40 = vld [vmem:[%s732_s1 + $0x130] sm:$0xff]  ;;  %v72_v42 = vld [vmem:[%s732_s1 + $0x1a8] sm:$0xff]  ;;  %v23_v45 = vld [vmem:[%s732_s1 + $0x20] sm:$0xff] }
  0x10   :  { %372 = vmatprep.subr.mxu1 %v76_v26  ;;  %339 = vmatprep.subr.mxu0 %v43_v27  ;;  %v56_v44 = vld [vmem:[%s732_s1 + $0x128] sm:$0xff]  ;;  %v71_v46 = vld [vmem:[%s732_s1 + $0x1a0] sm:$0xff]  ;;  %v38_v47 = vld [vmem:[%s732_s1 + $0x98] sm:$0xff] }
  0x11   :  { %373 = vmatpush3.msra.mxu1 %v60_v28  ;;  %340 = vmatpush3.msra.mxu0 %v27_v29  ;;  %v55_v48 = vld [vmem:[%s732_s1 + $0x120] sm:$0xff]  ;;  %v22_v49 = vld [vmem:[%s732_s1 + $0x18] sm:$0xff]  ;;  %v37_v51 = vld [vmem:[%s732_s1 + $0x90] sm:$0xff] }
  0x12   :  { %374 = vmatprep.subr.mxu1 %v75_v30  ;;  %341 = vmatprep.subr.mxu0 %v42_v31  ;;  %v70_v50 = vld [vmem:[%s732_s1 + $0x198] sm:$0xff]  ;;  %v21_v53 = vld [vmem:[%s732_s1 + $0x10] sm:$0xff]  ;;  %v36_v55 = vld [vmem:[%s732_s1 + $0x88] sm:$0xff] }
  0x13   :  { %375 = vmatpush3.msra.mxu1 %v59_v32  ;;  %342 = vmatpush3.msra.mxu0 %v26_v33  ;;  %v54_v52 = vld [vmem:[%s732_s1 + $0x118] sm:$0xff]  ;;  %v69_v54 = vld [vmem:[%s732_s1 + $0x190] sm:$0xff]  ;;  %v20_v57 = vld [vmem:[%s732_s1 + $0x8] sm:$0xff] }
  0x14   :  { %376 = vmatprep.subr.mxu1 %v74_v34  ;;  %343 = vmatprep.subr.mxu0 %v41_v35  ;;  %v53_v56 = vld [vmem:[%s732_s1 + $0x110] sm:$0xff]  ;;  %v68_v58 = vld [vmem:[%s732_s1 + $0x188] sm:$0xff]  ;;  %v35_v59 = vld [vmem:[%s732_s1 + $0x80] sm:$0xff] }
  0x15   :  { %377 = vmatpush3.msra.mxu1 %v58_v36  ;;  %344 = vmatpush3.msra.mxu0 %v25_v37  ;;  %v15_v60 = vld [vmem:[%s733_s0 + $0x8] sm:$0xff]  ;;  %v19_v61 = vld [vmem:[%s732_s1] sm:$0xff]  ;;  %v17_v2 = vld [vmem:[%s733_s0 + $0x18] sm:$0xff] }
  0x16   :  { %378 = vmatprep.subr.mxu1 %v73_v38  ;;  %345 = vmatprep.subr.mxu0 %v40_v39  ;;  %v52_v62 = vld [vmem:[%s732_s1 + $0x108] sm:$0xff]  ;;  %v14_v63 = vld [vmem:[%s733_s0] sm:$0xff]  ;;  %v98_v3 = vld [vmem:[%s732_s1 + $0x278] sm:$0xff] }
  0x17   :  { %379 = vmatpush3.msra.mxu1 %v57_v40  ;;  %346 = vmatpush3.msra.mxu0 %v24_v41  ;;  %v67_v0 = vld [vmem:[%s732_s1 + $0x180] sm:$0xff]  ;;  %v16_v4 = vld [vmem:[%s733_s0 + $0x10] sm:$0xff]  ;;  %v96_v7 = vld [vmem:[%s732_s1 + $0x268] sm:$0xff] }
  0x18   :  { %380 = vmatprep.subr.mxu1 %v72_v42  ;;  %347 = vmatprep.subr.mxu0 %v39_v43  ;;  %v51_v1 = vld [vmem:[%s732_s1 + $0x100] sm:$0xff]  ;;  %v97_v6 = vld [vmem:[%s732_s1 + $0x270] sm:$0xff]  ;;  %v94_v9 = vld [vmem:[%s732_s1 + $0x258] sm:$0xff] }
  0x19   :  { %381 = vmatpush3.msra.mxu1 %v56_v44  ;;  %348 = vmatpush3.msra.mxu0 %v23_v45  ;;  %v95_v8 = vld [vmem:[%s732_s1 + $0x260] sm:$0xff]  ;;  %v93_v10 = vld [vmem:[%s732_s1 + $0x250] sm:$0xff]  ;;  %v92_v11 = vld [vmem:[%s732_s1 + $0x248] sm:$0xff] }
  0x1a   :  { %382 = vmatprep.subr.mxu1 %v71_v46  ;;  %349 = vmatprep.subr.mxu0 %v38_v47  ;;  %v91_v12 = vld [vmem:[%s732_s1 + $0x240] sm:$0xff]  ;;  %v90_v13 = vld [vmem:[%s732_s1 + $0x238] sm:$0xff]  ;;  %v89_v14 = vld [vmem:[%s732_s1 + $0x230] sm:$0xff] }
  0x1b   :  { %383 = vmatpush3.msra.mxu1 %v55_v48  ;;  %350 = vmatpush3.msra.mxu0 %v22_v49  ;;  %v88_v15 = vld [vmem:[%s732_s1 + $0x228] sm:$0xff]  ;;  %v87_v16 = vld [vmem:[%s732_s1 + $0x220] sm:$0xff]  ;;  %v86_v17 = vld [vmem:[%s732_s1 + $0x218] sm:$0xff] }
  0x1c   :  { %384 = vmatprep.subr.mxu1 %v70_v50  ;;  %351 = vmatprep.subr.mxu0 %v37_v51  ;;  %v85_v18 = vld [vmem:[%s732_s1 + $0x210] sm:$0xff]  ;;  %v84_v19 = vld [vmem:[%s732_s1 + $0x208] sm:$0xff]  ;;  %v83_v20 = vld [vmem:[%s732_s1 + $0x200] sm:$0xff] }
  0x1d   :  { %385 = vmatpush3.msra.mxu1 %v54_v52  ;;  %352 = vmatpush3.msra.mxu0 %v21_v53  ;;  %v18_v21 = vld [vmem:[%s733_s0 + $0x20] sm:$0xff] }
  0x1e   :  { %386 = vmatprep.subr.mxu1 %v69_v54  ;;  %353 = vmatprep.subr.mxu0 %v36_v55  ;;  %v324_v26 = vld [vmem:[%s734_s2] ss:$0 sm:$0xff] }
  0x1f   :  { %387 = vmatpush3.msra.mxu1 %v53_v56  ;;  %354 = vmatpush3.msra.mxu0 %v20_v57 }
  0x20   :  { %388 = vmatprep.subr.mxu1 %v68_v58  ;;  %355 = vmatprep.subr.mxu0 %v35_v59 }
  0x21   :  { %170 = vmatprep.mubr.f32.mxu0 %v15_v60  ;;  %356 = vmatpush3.msra.mxu0 %v19_v61 }
  0x22   :  { %389 = vmatpush3.msra.mxu1 %v52_v62  ;;  %171 = vmatmul.mubr.f32.vlgmr.msra.gmra.mxu0 %v14_v63 }
  0x23   :  { %390 = vmatprep.subr.mxu1 %v67_v0  ;;  %412 = vmatprep.subr.mxu0 %v449_v5 }
  0x24   :  { %391 = vmatpush3.msra.mxu1 %v51_v1  ;;  %240 = vmatprep.mubr.f32.mxu1 %v17_v2 }
  0x25   :  { %413 = vmatpush3.msra.mxu0 %v98_v3  ;;  %241 = vmatmul.mubr.f32.vlgmr.msra.gmra.mxu1 %v16_v4 }
  0x26   :  { %414 = vmatprep.subr.mxu0 %v449_v5  ;;  %444 = vmatprep.mubr.msk.f32.mxu0 %vm450_vm0, %v449_v5 }
  0x27   :  { %415 = vmatpush3.msra.mxu0 %v97_v6 }
  0x28   :  { %416 = vmatprep.subr.mxu0 %v449_v5 }
  0x29   :  { %417 = vmatpush3.msra.mxu0 %v96_v7 }
  0x2a   :  { %418 = vmatprep.subr.mxu0 %v449_v5 }
  0x2b   :  { %419 = vmatpush3.msra.mxu0 %v95_v8 }
  0x2c   :  { %420 = vmatprep.subr.mxu0 %v449_v5 }
  0x2d   :  { %421 = vmatpush3.msra.mxu0 %v94_v9 }
  0x2e   :  { %422 = vmatprep.subr.mxu0 %v449_v5 }
  0x2f   :  { %423 = vmatpush3.msra.mxu0 %v93_v10 }
  0x30   :  { %424 = vmatprep.subr.mxu0 %v449_v5 }
  0x31   :  { %425 = vmatpush3.msra.mxu0 %v92_v11 }
  0x32   :  { %426 = vmatprep.subr.mxu0 %v449_v5 }
  0x33   :  { %427 = vmatpush3.msra.mxu0 %v91_v12 }
  0x34   :  { %428 = vmatprep.subr.mxu0 %v449_v5 }
  0x35   :  { %429 = vmatpush3.msra.mxu0 %v90_v13 }
  0x36   :  { %430 = vmatprep.subr.mxu0 %v449_v5 }
  0x37   :  { %431 = vmatpush3.msra.mxu0 %v89_v14 }
  0x38   :  { %432 = vmatprep.subr.mxu0 %v449_v5 }
  0x39   :  { %433 = vmatpush3.msra.mxu0 %v88_v15 }
  0x3a   :  { %434 = vmatprep.subr.mxu0 %v449_v5 }
  0x3b   :  { %435 = vmatpush3.msra.mxu0 %v87_v16 }
  0x3c   :  { %436 = vmatprep.subr.mxu0 %v449_v5 }
  0x3d   :  { %437 = vmatpush3.msra.mxu0 %v86_v17 }
  0x3e   :  { %438 = vmatprep.subr.mxu0 %v449_v5 }
  0x3f   :  { %439 = vmatpush3.msra.mxu0 %v85_v18 }
  0x40   :  { %440 = vmatprep.subr.mxu0 %v449_v5 }
  0x41   :  { %441 = vmatpush3.msra.mxu0 %v84_v19 }
  0x42   :  { %442 = vmatprep.subr.mxu0 %v449_v5 }
  0x43   :  { %443 = vmatpush3.msra.mxu0 %v83_v20 }
  0x44   :  { %445 = vmatmul.mubr.f32.vlgmr.msra.gmra.mxu0 %v18_v21 }
  0xe2   :  { %v357_v22 = vpop.f32.mrf.mxu0 }
  0xe4   :  { %v358_v23 = vpop.f32.mrf.mxu0 }
  0xe5   :  { %v392_v24 = vpop.f32.mrf.mxu1  ;;  %v359_v25 = vadd.f32 %v358_v23, %v357_v22 }
  0xe7   :  { %v393_v27 = vpop.f32.mrf.mxu1  ;;  %v173_v28 = vadd.f32 %v359_v25, %v324_v26 }
  0xe8   :  { %v394_v29 = vadd.f32 %v393_v27, %v392_v24 }
  0xea   :  { %v243_v30 = vadd.f32 %v394_v29, %v173_v28 }
 0x104   :  { %v312_v31 = vpop.f32.mrf.mxu0 }
 0x105   :  { %v313_v32 = vadd.f32 %v312_v31, %v243_v30 }
 0x106   :  { %v446_v33 = vpop.f32.mrf.mxu0 }
 0x107   :  { %vm316_vm1 = vcmp.gt.f32.partialorder %v313_v32, 0.0  ;;  %v317_v34 = vmul.f32 0.2, %v313_v32 }
 0x109   :  { %v318_v35 = vsel %vm316_vm1, %v313_v32, %v317_v34 }
 0x10a   :  { %319 = vst [vmem:[%s735_s3] sm:$0xff] %v318_v35 }

// kernel: discriminator_forward.7
= control target key start
LH: loop header
LB: loop body
LE: loop exit
PB: predicated region body
PF: predicated region fallthrough
CT: control target
= control target key end

     0   :  { %v20_v0 = vlaneseq  ;;  %vm49_vm0 = vcmask 7168   ;;  %s96_s1 = inlined_call_operand.vmem [shape: f32[1,256], index: 1, kind: input, shape index: {}]   ;;  %s97_s2 = inlined_call_operand.<no memory space> [shape: f32[1,1], index: 2, kind: input, shape index: {}]   ;;  %s98_s0 = inlined_call_operand.vmem [shape: f32[8,256], index: 0, kind: input, shape index: {}]   ;;  %s99_s3 = inlined_call_operand.vmem [shape: f32[8,1], index: 3, kind: output, shape index: {}]  }
   0x1   :  { %v8_v1 = vstv %s97_s2  ;;  %v18_v3 = vld [vmem:[%s96_s1] sm:$0x3]  ;;  %v17_v7 = vld [vmem:[%s98_s0 + $0x8] sm:$0xff] }
   0x2   :  { %v21_v2 = vshrl.u32 %v20_v0, 7  ;;  %9 = vst [vmem:[#allocation2] sm:$0x1] %v8_v1  ;;  %v16_v6 = vld [vmem:[%s98_s0] sm:$0xff] }
   0x4   :  { %v22_v4 = vsub.s32 0, %v21_v2  ;;  %v26_v5 = vsub.s32 1, %v21_v2 }
   0x6   :  { %v23_v8 = vrot.slane %v18_v3, %v22_v4  ;;  %v27_v9 = vrot.slane %v18_v3, %v26_v5 }
   0x8   :  { %v30_v10 = vmul.f32 %v23_v8, %v16_v6  ;;  %v31_v11 = vmul.f32 %v27_v9, %v17_v7 }
   0x9   :  { %v55_v13 = vld [vmem:[#allocation2] ss:$0 sm:$0xff] }
   0xa   :  { %v32_v12 = vadd.f32 %v31_v11, %v30_v10 }
   0xc   :  { %33 = vadd.xlane.f32.xlu0 %v32_v12 }
  0x95   :  { %v34_v14 = vpop.xlane.xlu0 %33 }
  0x96   :  { %v42_v15 = vadd.f32 %v55_v13, %v34_v14 }
  0x98   :  { %v56_v16 = vmul.f32 -1.442695, %v42_v15 }
  0x9a   :  { %57 = vpow2.f32 %v56_v16 }
  0xa7   :  { %v58_v17 = vpop.eup %57 }
  0xa8   :  { %v46_v18 = vadd.f32 1.0, %v58_v17 }
  0xaa   :  { %59 = vrcp.f32 %v46_v18 }
  0xb7   :  { %v60_v19 = vpop.eup %59 }
  0xb8   :  { %50 = vst.msk [vmem:[%s99_s3] sm:$0xff] %vm49_vm0, %v60_v19 }

</bundles_post_ra>
